<compile_context>
chip_gen: v5e
topology: v5e:2x2
jax: 0.10.0
libtpu: 0.0.40
codegen_flags: <defaults>
</compile_context>

<pallas_src>
import functools
import math

import jax
import jax.numpy as jnp
from jax.experimental import pallas as pl
from jax.experimental.pallas import tpu as pltpu


def _layernorm(x, gamma, beta, eps=1e-5):
    # PyTorch nn.LayerNorm: biased variance over the last axis.
    mean = jnp.mean(x, axis=-1, keepdims=True)
    var = jnp.mean((x - mean) ** 2, axis=-1, keepdims=True)
    return (x - mean) * jax.lax.rsqrt(var + eps) * gamma + beta


def transformer_kernel(
    tok_ref,    # (b_blk, t, k)  token embeddings for this batch block
    pos_ref,    # (t, k)         positional embeddings
    wqkv_ref,   # (k, 3*h*k)     fused Q|K|V projection for layer d
    wu_ref,     # (h*k, k)       unifyheads weight
    w1_ref,     # (k, 4k)        ff weight 1
    b1_ref,     # (1, 4k)        ff bias 1
    w2_ref,     # (4k, k)        ff weight 2
    vec_ref,    # (6, k)         rows: [bu, g1, bt1, b2, g2, bt2]
    wp_ref,     # (k, c_pad)     classifier weight (lane-padded)
    bp_ref,     # (1, c_pad)     classifier bias  (padding = -1e30)
    out_ref,    # (b_blk, c_pad) log-probs for this batch block
    x_scr,      # VMEM (b_blk*t, k) activation carried across the depth axis
    *,
    heads,
    k,
    b_blk,
    t,
):
    d = pl.program_id(1)
    depth = pl.num_programs(1)
    m = b_blk * t
    hk = heads * k

    # ---- layer 0: embed + positional add, flatten to (M, k) ----
    @pl.when(d == 0)
    def _init():
        x_scr[...] = (tok_ref[...] + pos_ref[...]).reshape(m, k)

    x = x_scr[...]                                            # (M, k)

    # ---- fused QKV projection: single lane-dense (M, k) @ (k, 3hk) matmul ----
    qkv = jnp.dot(x, wqkv_ref[...], preferred_element_type=jnp.float32)
    q_all = qkv[:, 0:hk]          # 128-aligned lane slices (hk multiple of 128
    k_all = qkv[:, hk:2 * hk]     # in the default config)
    v_all = qkv[:, 2 * hk:3 * hk]

    # both k**-1/4 scales folded into one multiply of the (t, t) scores
    inv_sqrt_k = 1.0 / math.sqrt(float(k))

    head_outs = []
    for hh in range(heads):
        sl = slice(hh * k, (hh + 1) * k)
        qh = q_all[:, sl].reshape(b_blk, t, k)
        kh = k_all[:, sl].reshape(b_blk, t, k)
        vh = v_all[:, sl].reshape(b_blk, t, k)
        # batched over the sequence block, contraction on the last dim (no .T)
        s = jnp.einsum("bqd,bkd->bqk", qh, kh,
                       preferred_element_type=jnp.float32) * inv_sqrt_k  # (b,t,t)
        s = s - jnp.max(s, axis=-1, keepdims=True)
        p = jnp.exp(s)
        p = p * pl.reciprocal(jnp.sum(p, axis=-1, keepdims=True), approx=True)
        head_outs.append(
            jnp.einsum("bqk,bkd->bqd", p, vh,
                       preferred_element_type=jnp.float32))              # (b,t,k)

    # unifyheads: single (M, hk) @ (hk, k) matmul
    ho = jnp.concatenate(head_outs, axis=-1).reshape(m, hk)
    bu = vec_ref[0:1, :]
    attn = jnp.dot(ho, wu_ref[...], preferred_element_type=jnp.float32) + bu

    # ---- residual + LayerNorm 1 ----
    g1, bt1 = vec_ref[1:2, :], vec_ref[2:3, :]
    x = _layernorm(attn + x, g1, bt1)

    # ---- feed-forward (k -> 4k -> k) ----
    h1 = jnp.dot(x, w1_ref[...], preferred_element_type=jnp.float32) + b1_ref[...]
    h1 = jnp.maximum(h1, 0.0)
    b2 = vec_ref[3:4, :]
    ff = jnp.dot(h1, w2_ref[...], preferred_element_type=jnp.float32) + b2

    # ---- residual + LayerNorm 2 ----
    g2, bt2 = vec_ref[4:5, :], vec_ref[5:6, :]
    x = _layernorm(ff + x, g2, bt2)

    # carry activation to the next depth step (skip the store on the last one)
    @pl.when(d < depth - 1)
    def _carry():
        x_scr[...] = x

    # ---- final layer: mean pool, classifier, log_softmax (lane-dense) ----
    @pl.when(d == depth - 1)
    def _finalize():
        pooled = jnp.mean(x.reshape(b_blk, t, k), axis=1)                # (b_blk,k)
        logits = jnp.dot(pooled, wp_ref[...], preferred_element_type=jnp.float32)
        logits = logits + bp_ref[...]                                    # (b_blk,c_pad)
        mx = jnp.max(logits, axis=-1, keepdims=True)
        lse = mx + jnp.log(jnp.sum(jnp.exp(logits - mx), axis=-1, keepdims=True))
        out_ref[...] = logits - lse


def init_params(key, *, k, heads, depth, seq_length, num_tokens, num_classes):
    hk = heads * k
    keys = jax.random.split(key, 10)

    def nrm(kk_, shape, s=0.1):
        return jax.random.normal(kk_, shape, jnp.float32) * s

    p = {
        "token_emb": nrm(keys[0], (num_tokens, k), 1.0),
        "pos_emb": nrm(keys[1], (seq_length, k), 1.0),
        "wq": nrm(keys[2], (depth, k, hk)),
        "wk": nrm(keys[3], (depth, k, hk)),
        "wv": nrm(keys[4], (depth, k, hk)),
        "wu": nrm(keys[5], (depth, hk, k)),
        "bu": jnp.zeros((depth, 1, k), jnp.float32),
        "g1": jnp.ones((depth, 1, k), jnp.float32),
        "bt1": jnp.zeros((depth, 1, k), jnp.float32),
        "w1": nrm(keys[6], (depth, k, 4 * k)),
        "b1": jnp.zeros((depth, 1, 4 * k), jnp.float32),
        "w2": nrm(keys[7], (depth, 4 * k, k)),
        "b2": jnp.zeros((depth, 1, k), jnp.float32),
        "g2": jnp.ones((depth, 1, k), jnp.float32),
        "bt2": jnp.zeros((depth, 1, k), jnp.float32),
        "wp": nrm(keys[8], (k, num_classes)),
        "bp": jnp.zeros((1, num_classes), jnp.float32),
    }
    return p


def transformer_forward(tokens, params, *, depth, heads, k):
    """tokens: (b, t) int32 -> (b, num_classes) float32 log-probs."""
    # Embedding gather is plain-JAX glue; all matmul/softmax/layernorm compute
    # happens inside the Pallas kernel.
    tok_emb = params["token_emb"][tokens]          # (b, t, k)
    b, t, _ = tok_emb.shape
    pos = params["pos_emb"][:t]                    # (t, k)
    num_classes = params["wp"].shape[1]
    hk = heads * k

    # lane-dense classifier head: zero-pad weights; pad bias with -1e30 so the
    # padded logits never affect the log_softmax.
    c_pad = ((num_classes + 127) // 128) * 128
    wp = jnp.pad(params["wp"], ((0, 0), (0, c_pad - num_classes)))
    bp = jnp.pad(params["bp"], ((0, 0), (0, c_pad - num_classes)),
                 constant_values=-1e30)

    # layout plumbing (outside the kernel):
    #  * fused QKV weight -> one MXU matmul per layer
    #  * six per-layer (1, k) vectors -> one (6, k) slab -> one DMA per step
    wqkv = jnp.concatenate([params["wq"], params["wk"], params["wv"]], axis=-1)
    vecs = jnp.concatenate([params["bu"], params["g1"], params["bt1"],
                            params["b2"], params["g2"], params["bt2"]], axis=1)

    # batch block: amortize per-grid-step overhead and grow the matmul M dim.
    b_blk = 8 if b % 8 == 0 else b
    assert b % b_blk == 0

    per_layer = [wqkv, params["wu"], params["w1"], params["b1"],
                 params["w2"], vecs]

    def layer_spec(arr):
        # depth dim squeezed; block index d selects the current layer.
        return pl.BlockSpec((None,) + tuple(arr.shape[1:]),
                            lambda i, d: (d, 0, 0))

    def const_spec(arr):
        nd = arr.ndim
        return pl.BlockSpec(tuple(arr.shape), lambda i, d, nd=nd: (0,) * nd)

    in_specs = ([pl.BlockSpec((b_blk, t, k), lambda i, d: (i, 0, 0)),
                 const_spec(pos)]
                + [layer_spec(w) for w in per_layer]
                + [const_spec(wp), const_spec(bp)])
    out_spec = pl.BlockSpec((b_blk, c_pad), lambda i, d: (i, 0))

    kernel = functools.partial(transformer_kernel, heads=heads, k=k,
                               b_blk=b_blk, t=t)

    # scoped VMEM: resident blocks (double-buffered) + headroom.
    block_elems = (b_blk * t * k + t * k
                   + sum(int(math.prod(w.shape[1:])) for w in per_layer)
                   + k * c_pad + c_pad + b_blk * c_pad + b_blk * t * k)
    vmem_limit = int(min(2 * 4 * block_elems + (32 << 20), 64 << 20))

    flops = 2 * b * t * depth * (3 * k * hk + 2 * t * hk + hk * k + 8 * k * k) \
        + 2 * b * k * c_pad
    cost = pl.CostEstimate(
        flops=int(flops),
        transcendentals=int(b * depth * heads * t * t + b * c_pad),
        bytes_accessed=int(4 * (tok_emb.size + pos.size
                                + (b // b_blk) * sum(int(w.size) for w in per_layer)
                                + wp.size + bp.size + b * c_pad)),
    )

    out = pl.pallas_call(
        kernel,
        out_shape=jax.ShapeDtypeStruct((b, c_pad), jnp.float32),
        grid_spec=pltpu.PrefetchScalarGridSpec(
            num_scalar_prefetch=0,
            grid=(b // b_blk, depth),            # depth = trailing "arbitrary" axis
            in_specs=in_specs,
            out_specs=out_spec,
            scratch_shapes=[pltpu.VMEM((b_blk * t, k), jnp.float32)],
        ),
        compiler_params=pltpu.CompilerParams(
            dimension_semantics=("parallel", "arbitrary"),
            vmem_limit_bytes=vmem_limit),
        cost_estimate=cost,
    )(tok_emb, pos, *per_layer, wp, bp)

    return out[:, :num_classes]                   # (b, num_classes)


if __name__ == "__main__":
    K, HEADS, DEPTH = 32, 4, 2
    SEQ, NTOK, NCLS, B = 8, 100, 4, 2

    key = jax.random.PRNGKey(0)
    pkey, xkey = jax.random.split(key)
    params = init_params(pkey, k=K, heads=HEADS, depth=DEPTH,
                         seq_length=SEQ, num_tokens=NTOK, num_classes=NCLS)
    x = jax.random.randint(xkey, (B, SEQ), 0, NTOK, dtype=jnp.int32)

    out = transformer_forward(x, params, depth=DEPTH, heads=HEADS, k=K)
    out = jax.block_until_ready(out)

    assert out.shape == (B, NCLS), out.shape
    assert bool(jnp.all(jnp.isfinite(out)))
    # rows of log-probs must (approximately) sum to 1 after exp
    assert bool(jnp.all(jnp.abs(jnp.sum(jnp.exp(out), axis=1) - 1.0) < 1e-4))
    print("KERNEL_OK")
</pallas_src>

<mosaic_0001>
module attributes {stable_mosaic.version = 11 : i64} {
  func.func @transformer_kernel(%arg0: i32, %arg1: i32, %arg2: memref<2x8x32xf32, #tpu.memory_space<vmem>>, %arg3: memref<8x32xf32, #tpu.memory_space<vmem>>, %arg4: memref<1x32x384xf32, #tpu.memory_space<vmem>>, %arg5: memref<1x128x32xf32, #tpu.memory_space<vmem>>, %arg6: memref<1x32x128xf32, #tpu.memory_space<vmem>>, %arg7: memref<1x1x128xf32, #tpu.memory_space<vmem>>, %arg8: memref<1x128x32xf32, #tpu.memory_space<vmem>>, %arg9: memref<1x6x32xf32, #tpu.memory_space<vmem>>, %arg10: memref<32x128xf32, #tpu.memory_space<vmem>>, %arg11: memref<1x128xf32, #tpu.memory_space<vmem>>, %arg12: memref<2x128xf32, #tpu.memory_space<vmem>>, %arg13: memref<16x32xf32, #tpu.memory_space<vmem>>) attributes {dimension_semantics = [#tpu.dimension_semantics<parallel>, #tpu.dimension_semantics<arbitrary>], iteration_bounds = array<i64: 1, 2>, scalar_prefetch = 0 : i64, scratch_operands = 1 : i64, tpu.core_type = #tpu.core_type<tc>, window_params = [{transform_indices = @transform_0, window_bounds = array<i64: 2, 8, 32>}, {pipeline_mode = #tpu.pipeline_mode<synchronous>, transform_indices = @transform_1, window_bounds = array<i64: 8, 32>}, {transform_indices = @transform_2, window_bounds = array<i64: 1, 32, 384>}, {transform_indices = @transform_3, window_bounds = array<i64: 1, 128, 32>}, {transform_indices = @transform_4, window_bounds = array<i64: 1, 32, 128>}, {transform_indices = @transform_5, window_bounds = array<i64: 1, 1, 128>}, {transform_indices = @transform_6, window_bounds = array<i64: 1, 128, 32>}, {transform_indices = @transform_7, window_bounds = array<i64: 1, 6, 32>}, {pipeline_mode = #tpu.pipeline_mode<synchronous>, transform_indices = @transform_8, window_bounds = array<i64: 32, 128>}, {pipeline_mode = #tpu.pipeline_mode<synchronous>, transform_indices = @transform_9, window_bounds = array<i64: 1, 128>}, {transform_indices = @transform_10, window_bounds = array<i64: 2, 128>}]} {
    %c0_i32 = arith.constant 0 : i32
    %0 = arith.cmpi eq, %arg1, %c0_i32 : i32
    %1 = arith.extui %0 : i1 to i32
    %c0_i32_0 = arith.constant 0 : i32
    %2 = arith.cmpi ne, %1, %c0_i32_0 : i32
    scf.if %2 {
      %c0_67 = arith.constant 0 : index
      %c0_68 = arith.constant 0 : index
      %c0_69 = arith.constant 0 : index
      %175 = vector.load %arg2[%c0_67, %c0_68, %c0_69] : memref<2x8x32xf32, #tpu.memory_space<vmem>>, vector<2x8x32xf32>
      %c0_70 = arith.constant 0 : index
      %c0_71 = arith.constant 0 : index
      %176 = vector.load %arg3[%c0_70, %c0_71] : memref<8x32xf32, #tpu.memory_space<vmem>>, vector<8x32xf32>
      %177 = vector.shape_cast %176 : vector<8x32xf32> to vector<1x8x32xf32>
      %178 = vector.broadcast %177 : vector<1x8x32xf32> to vector<2x8x32xf32>
      %179 = arith.addf %175, %178 : vector<2x8x32xf32>
      %180 = vector.shape_cast %179 : vector<2x8x32xf32> to vector<16x32xf32>
      %c0_72 = arith.constant 0 : index
      %c0_73 = arith.constant 0 : index
      %181 = vector.load %arg13[%c0_72, %c0_73] : memref<16x32xf32, #tpu.memory_space<vmem>>, vector<16x32xf32>
      tpu.vector_store %arg13[%c0_72, %c0_73], %180 {strides = array<i32>} : memref<16x32xf32, #tpu.memory_space<vmem>>, vector<16x32xf32>,
    } else {
    }
    %c0 = arith.constant 0 : index
    %c0_1 = arith.constant 0 : index
    %3 = vector.load %arg13[%c0, %c0_1] : memref<16x32xf32, #tpu.memory_space<vmem>>, vector<16x32xf32>
    %c0_2 = arith.constant 0 : index
    %c0_3 = arith.constant 0 : index
    %c0_4 = arith.constant 0 : index
    %4 = vector.load %arg4[%c0_2, %c0_3, %c0_4] : memref<1x32x384xf32, #tpu.memory_space<vmem>>, vector<1x32x384xf32>
    %5 = vector.shape_cast %4 : vector<1x32x384xf32> to vector<32x384xf32>
    %cst = arith.constant dense<0.000000e+00> : vector<16x384xf32>
    %6 = tpu.matmul %3, %5, %cst {dimension_numbers = #tpu.dot_dimension_numbers<[1], [0], [0], [1], [0, 0, 1, 1], [], []>} : vector<16x32xf32>, vector<32x384xf32>, vector<16x384xf32> -> vector<16x384xf32>
    %7 = vector.extract_strided_slice %6 {offsets = [0, 0], sizes = [16, 128], strides = [1, 1]} : vector<16x384xf32> to vector<16x128xf32>
    %8 = vector.extract_strided_slice %6 {offsets = [0, 128], sizes = [16, 128], strides = [1, 1]} : vector<16x384xf32> to vector<16x128xf32>
    %9 = vector.extract_strided_slice %6 {offsets = [0, 256], sizes = [16, 128], strides = [1, 1]} : vector<16x384xf32> to vector<16x128xf32>
    %10 = vector.extract_strided_slice %7 {offsets = [0, 0], sizes = [16, 32], strides = [1, 1]} : vector<16x128xf32> to vector<16x32xf32>
    %11 = vector.shape_cast %10 : vector<16x32xf32> to vector<2x8x32xf32>
    %12 = vector.extract_strided_slice %8 {offsets = [0, 0], sizes = [16, 32], strides = [1, 1]} : vector<16x128xf32> to vector<16x32xf32>
    %13 = vector.shape_cast %12 : vector<16x32xf32> to vector<2x8x32xf32>
    %14 = vector.extract_strided_slice %9 {offsets = [0, 0], sizes = [16, 32], strides = [1, 1]} : vector<16x128xf32> to vector<16x32xf32>
    %15 = vector.shape_cast %14 : vector<16x32xf32> to vector<2x8x32xf32>
    "tpu.trace_start"() <{level = 10 : i32, message = "bqd,bkd->bqk"}> : () -> ()
    %cst_5 = arith.constant dense<0.000000e+00> : vector<2x8x8xf32>
    %16 = tpu.matmul %11, %13, %cst_5 {dimension_numbers = #tpu.dot_dimension_numbers<[2], [2], [1], [1], [0, 0, 0, 1, 1, 1], [0], [0]>} : vector<2x8x32xf32>, vector<2x8x32xf32>, vector<2x8x8xf32> -> vector<2x8x8xf32>
    "tpu.trace_stop"() : () -> ()
    %cst_6 = arith.constant 0.176776692 : f32
    %17 = vector.broadcast %cst_6 : f32 to vector<2x8x8xf32>
    %18 = arith.mulf %16, %17 : vector<2x8x8xf32>
    %cst_7 = arith.constant dense<0xFF800000> : vector<2x8xf32>
    %19 = vector.multi_reduction <maximumf>, %18, %cst_7 [2] : vector<2x8x8xf32> to vector<2x8xf32>
    %20 = vector.shape_cast %19 : vector<2x8xf32> to vector<2x8x1xf32>
    %21 = vector.broadcast %20 : vector<2x8x1xf32> to vector<2x8x8xf32>
    %22 = arith.subf %18, %21 : vector<2x8x8xf32>
    %23 = math.exp %22 : vector<2x8x8xf32>
    %cst_8 = arith.constant dense<0.000000e+00> : vector<2x8xf32>
    %24 = vector.multi_reduction <add>, %23, %cst_8 [2] : vector<2x8x8xf32> to vector<2x8xf32>
    %25 = vector.shape_cast %24 : vector<2x8xf32> to vector<2x8x1xf32>
    %26 = tpu.reciprocal %25 {approx = true} : vector<2x8x1xf32> -> vector<2x8x1xf32>
    %27 = vector.broadcast %26 : vector<2x8x1xf32> to vector<2x8x8xf32>
    %28 = arith.mulf %23, %27 : vector<2x8x8xf32>
    "tpu.trace_start"() <{level = 10 : i32, message = "bqk,bkd->bqd"}> : () -> ()
    %cst_9 = arith.constant dense<0.000000e+00> : vector<2x8x32xf32>
    %29 = tpu.matmul %28, %15, %cst_9 {dimension_numbers = #tpu.dot_dimension_numbers<[2], [1], [1], [2], [0, 0, 0, 1, 1, 2], [0], [0]>} : vector<2x8x8xf32>, vector<2x8x32xf32>, vector<2x8x32xf32> -> vector<2x8x32xf32>
    "tpu.trace_stop"() : () -> ()
    %30 = vector.extract_strided_slice %7 {offsets = [0, 32], sizes = [16, 32], strides = [1, 1]} : vector<16x128xf32> to vector<16x32xf32>
    %31 = vector.shape_cast %30 : vector<16x32xf32> to vector<2x8x32xf32>
    %32 = vector.extract_strided_slice %8 {offsets = [0, 32], sizes = [16, 32], strides = [1, 1]} : vector<16x128xf32> to vector<16x32xf32>
    %33 = vector.shape_cast %32 : vector<16x32xf32> to vector<2x8x32xf32>
    %34 = vector.extract_strided_slice %9 {offsets = [0, 32], sizes = [16, 32], strides = [1, 1]} : vector<16x128xf32> to vector<16x32xf32>
    %35 = vector.shape_cast %34 : vector<16x32xf32> to vector<2x8x32xf32>
    "tpu.trace_start"() <{level = 10 : i32, message = "bqd,bkd->bqk"}> : () -> ()
    %cst_10 = arith.constant dense<0.000000e+00> : vector<2x8x8xf32>
    %36 = tpu.matmul %31, %33, %cst_10 {dimension_numbers = #tpu.dot_dimension_numbers<[2], [2], [1], [1], [0, 0, 0, 1, 1, 1], [0], [0]>} : vector<2x8x32xf32>, vector<2x8x32xf32>, vector<2x8x8xf32> -> vector<2x8x8xf32>
    "tpu.trace_stop"() : () -> ()
    %cst_11 = arith.constant 0.176776692 : f32
    %37 = vector.broadcast %cst_11 : f32 to vector<2x8x8xf32>
    %38 = arith.mulf %36, %37 : vector<2x8x8xf32>
    %cst_12 = arith.constant dense<0xFF800000> : vector<2x8xf32>
    %39 = vector.multi_reduction <maximumf>, %38, %cst_12 [2] : vector<2x8x8xf32> to vector<2x8xf32>
    %40 = vector.shape_cast %39 : vector<2x8xf32> to vector<2x8x1xf32>
    %41 = vector.broadcast %40 : vector<2x8x1xf32> to vector<2x8x8xf32>
    %42 = arith.subf %38, %41 : vector<2x8x8xf32>
    %43 = math.exp %42 : vector<2x8x8xf32>
    %cst_13 = arith.constant dense<0.000000e+00> : vector<2x8xf32>
    %44 = vector.multi_reduction <add>, %43, %cst_13 [2] : vector<2x8x8xf32> to vector<2x8xf32>
    %45 = vector.shape_cast %44 : vector<2x8xf32> to vector<2x8x1xf32>
    %46 = tpu.reciprocal %45 {approx = true} : vector<2x8x1xf32> -> vector<2x8x1xf32>
    %47 = vector.broadcast %46 : vector<2x8x1xf32> to vector<2x8x8xf32>
    %48 = arith.mulf %43, %47 : vector<2x8x8xf32>
    "tpu.trace_start"() <{level = 10 : i32, message = "bqk,bkd->bqd"}> : () -> ()
    %cst_14 = arith.constant dense<0.000000e+00> : vector<2x8x32xf32>
    %49 = tpu.matmul %48, %35, %cst_14 {dimension_numbers = #tpu.dot_dimension_numbers<[2], [1], [1], [2], [0, 0, 0, 1, 1, 2], [0], [0]>} : vector<2x8x8xf32>, vector<2x8x32xf32>, vector<2x8x32xf32> -> vector<2x8x32xf32>
    "tpu.trace_stop"() : () -> ()
    %50 = vector.extract_strided_slice %7 {offsets = [0, 64], sizes = [16, 32], strides = [1, 1]} : vector<16x128xf32> to vector<16x32xf32>
    %51 = vector.shape_cast %50 : vector<16x32xf32> to vector<2x8x32xf32>
    %52 = vector.extract_strided_slice %8 {offsets = [0, 64], sizes = [16, 32], strides = [1, 1]} : vector<16x128xf32> to vector<16x32xf32>
    %53 = vector.shape_cast %52 : vector<16x32xf32> to vector<2x8x32xf32>
    %54 = vector.extract_strided_slice %9 {offsets = [0, 64], sizes = [16, 32], strides = [1, 1]} : vector<16x128xf32> to vector<16x32xf32>
    %55 = vector.shape_cast %54 : vector<16x32xf32> to vector<2x8x32xf32>
    "tpu.trace_start"() <{level = 10 : i32, message = "bqd,bkd->bqk"}> : () -> ()
    %cst_15 = arith.constant dense<0.000000e+00> : vector<2x8x8xf32>
    %56 = tpu.matmul %51, %53, %cst_15 {dimension_numbers = #tpu.dot_dimension_numbers<[2], [2], [1], [1], [0, 0, 0, 1, 1, 1], [0], [0]>} : vector<2x8x32xf32>, vector<2x8x32xf32>, vector<2x8x8xf32> -> vector<2x8x8xf32>
    "tpu.trace_stop"() : () -> ()
    %cst_16 = arith.constant 0.176776692 : f32
    %57 = vector.broadcast %cst_16 : f32 to vector<2x8x8xf32>
    %58 = arith.mulf %56, %57 : vector<2x8x8xf32>
    %cst_17 = arith.constant dense<0xFF800000> : vector<2x8xf32>
    %59 = vector.multi_reduction <maximumf>, %58, %cst_17 [2] : vector<2x8x8xf32> to vector<2x8xf32>
    %60 = vector.shape_cast %59 : vector<2x8xf32> to vector<2x8x1xf32>
    %61 = vector.broadcast %60 : vector<2x8x1xf32> to vector<2x8x8xf32>
    %62 = arith.subf %58, %61 : vector<2x8x8xf32>
    %63 = math.exp %62 : vector<2x8x8xf32>
    %cst_18 = arith.constant dense<0.000000e+00> : vector<2x8xf32>
    %64 = vector.multi_reduction <add>, %63, %cst_18 [2] : vector<2x8x8xf32> to vector<2x8xf32>
    %65 = vector.shape_cast %64 : vector<2x8xf32> to vector<2x8x1xf32>
    %66 = tpu.reciprocal %65 {approx = true} : vector<2x8x1xf32> -> vector<2x8x1xf32>
    %67 = vector.broadcast %66 : vector<2x8x1xf32> to vector<2x8x8xf32>
    %68 = arith.mulf %63, %67 : vector<2x8x8xf32>
    "tpu.trace_start"() <{level = 10 : i32, message = "bqk,bkd->bqd"}> : () -> ()
    %cst_19 = arith.constant dense<0.000000e+00> : vector<2x8x32xf32>
    %69 = tpu.matmul %68, %55, %cst_19 {dimension_numbers = #tpu.dot_dimension_numbers<[2], [1], [1], [2], [0, 0, 0, 1, 1, 2], [0], [0]>} : vector<2x8x8xf32>, vector<2x8x32xf32>, vector<2x8x32xf32> -> vector<2x8x32xf32>
    "tpu.trace_stop"() : () -> ()
    %70 = vector.extract_strided_slice %7 {offsets = [0, 96], sizes = [16, 32], strides = [1, 1]} : vector<16x128xf32> to vector<16x32xf32>
    %71 = vector.shape_cast %70 : vector<16x32xf32> to vector<2x8x32xf32>
    %72 = vector.extract_strided_slice %8 {offsets = [0, 96], sizes = [16, 32], strides = [1, 1]} : vector<16x128xf32> to vector<16x32xf32>
    %73 = vector.shape_cast %72 : vector<16x32xf32> to vector<2x8x32xf32>
    %74 = vector.extract_strided_slice %9 {offsets = [0, 96], sizes = [16, 32], strides = [1, 1]} : vector<16x128xf32> to vector<16x32xf32>
    %75 = vector.shape_cast %74 : vector<16x32xf32> to vector<2x8x32xf32>
    "tpu.trace_start"() <{level = 10 : i32, message = "bqd,bkd->bqk"}> : () -> ()
    %cst_20 = arith.constant dense<0.000000e+00> : vector<2x8x8xf32>
    %76 = tpu.matmul %71, %73, %cst_20 {dimension_numbers = #tpu.dot_dimension_numbers<[2], [2], [1], [1], [0, 0, 0, 1, 1, 1], [0], [0]>} : vector<2x8x32xf32>, vector<2x8x32xf32>, vector<2x8x8xf32> -> vector<2x8x8xf32>
    "tpu.trace_stop"() : () -> ()
    %cst_21 = arith.constant 0.176776692 : f32
    %77 = vector.broadcast %cst_21 : f32 to vector<2x8x8xf32>
    %78 = arith.mulf %76, %77 : vector<2x8x8xf32>
    %cst_22 = arith.constant dense<0xFF800000> : vector<2x8xf32>
    %79 = vector.multi_reduction <maximumf>, %78, %cst_22 [2] : vector<2x8x8xf32> to vector<2x8xf32>
    %80 = vector.shape_cast %79 : vector<2x8xf32> to vector<2x8x1xf32>
    %81 = vector.broadcast %80 : vector<2x8x1xf32> to vector<2x8x8xf32>
    %82 = arith.subf %78, %81 : vector<2x8x8xf32>
    %83 = math.exp %82 : vector<2x8x8xf32>
    %cst_23 = arith.constant dense<0.000000e+00> : vector<2x8xf32>
    %84 = vector.multi_reduction <add>, %83, %cst_23 [2] : vector<2x8x8xf32> to vector<2x8xf32>
    %85 = vector.shape_cast %84 : vector<2x8xf32> to vector<2x8x1xf32>
    %86 = tpu.reciprocal %85 {approx = true} : vector<2x8x1xf32> -> vector<2x8x1xf32>
    %87 = vector.broadcast %86 : vector<2x8x1xf32> to vector<2x8x8xf32>
    %88 = arith.mulf %83, %87 : vector<2x8x8xf32>
    "tpu.trace_start"() <{level = 10 : i32, message = "bqk,bkd->bqd"}> : () -> ()
    %cst_24 = arith.constant dense<0.000000e+00> : vector<2x8x32xf32>
    %89 = tpu.matmul %88, %75, %cst_24 {dimension_numbers = #tpu.dot_dimension_numbers<[2], [1], [1], [2], [0, 0, 0, 1, 1, 2], [0], [0]>} : vector<2x8x8xf32>, vector<2x8x32xf32>, vector<2x8x32xf32> -> vector<2x8x32xf32>
    "tpu.trace_stop"() : () -> ()
    %90 = tpu.concatenate %29, %49, %69, %89 in 2 : vector<2x8x32xf32>, vector<2x8x32xf32>, vector<2x8x32xf32>, vector<2x8x32xf32> -> vector<2x8x128xf32>
    %91 = vector.shape_cast %90 : vector<2x8x128xf32> to vector<16x128xf32>
    %c0_25 = arith.constant 0 : index
    %c0_26 = arith.constant 0 : index
    %c0_27 = arith.constant 0 : index
    %92 = vector.load %arg9[%c0_25, %c0_26, %c0_27] : memref<1x6x32xf32, #tpu.memory_space<vmem>>, vector<1x1x32xf32>
    %93 = vector.shape_cast %92 : vector<1x1x32xf32> to vector<1x32xf32>
    %c0_28 = arith.constant 0 : index
    %c0_29 = arith.constant 0 : index
    %c0_30 = arith.constant 0 : index
    %94 = vector.load %arg5[%c0_28, %c0_29, %c0_30] : memref<1x128x32xf32, #tpu.memory_space<vmem>>, vector<1x128x32xf32>
    %95 = vector.shape_cast %94 : vector<1x128x32xf32> to vector<128x32xf32>
    %cst_31 = arith.constant dense<0.000000e+00> : vector<16x32xf32>
    %96 = tpu.matmul %91, %95, %cst_31 {dimension_numbers = #tpu.dot_dimension_numbers<[1], [0], [0], [1], [0, 0, 1, 1], [], []>} : vector<16x128xf32>, vector<128x32xf32>, vector<16x32xf32> -> vector<16x32xf32>
    %97 = vector.broadcast %93 : vector<1x32xf32> to vector<16x32xf32>
    %98 = arith.addf %96, %97 : vector<16x32xf32>
    %c0_32 = arith.constant 0 : index
    %c1 = arith.constant 1 : index
    %c0_33 = arith.constant 0 : index
    %99 = vector.load %arg9[%c0_32, %c1, %c0_33] : memref<1x6x32xf32, #tpu.memory_space<vmem>>, vector<1x1x32xf32>
    %100 = vector.shape_cast %99 : vector<1x1x32xf32> to vector<1x32xf32>
    %c0_34 = arith.constant 0 : index
    %c2 = arith.constant 2 : index
    %c0_35 = arith.constant 0 : index
    %101 = vector.load %arg9[%c0_34, %c2, %c0_35] : memref<1x6x32xf32, #tpu.memory_space<vmem>>, vector<1x1x32xf32>
    %102 = vector.shape_cast %101 : vector<1x1x32xf32> to vector<1x32xf32>
    %103 = arith.addf %98, %3 : vector<16x32xf32>
    %cst_36 = arith.constant dense<0.000000e+00> : vector<16xf32>
    %104 = vector.multi_reduction <add>, %103, %cst_36 [1] : vector<16x32xf32> to vector<16xf32>
    %105 = vector.shape_cast %104 : vector<16xf32> to vector<16x1xf32>
    %cst_37 = arith.constant 3.200000e+01 : f32
    %106 = vector.broadcast %cst_37 : f32 to vector<16x1xf32>
    %107 = arith.divf %105, %106 : vector<16x1xf32>
    %108 = vector.broadcast %107 : vector<16x1xf32> to vector<16x32xf32>
    %109 = arith.subf %103, %108 : vector<16x32xf32>
    %110 = arith.mulf %109, %109 : vector<16x32xf32>
    %cst_38 = arith.constant dense<0.000000e+00> : vector<16xf32>
    %111 = vector.multi_reduction <add>, %110, %cst_38 [1] : vector<16x32xf32> to vector<16xf32>
    %112 = vector.shape_cast %111 : vector<16xf32> to vector<16x1xf32>
    %cst_39 = arith.constant 3.200000e+01 : f32
    %113 = vector.broadcast %cst_39 : f32 to vector<16x1xf32>
    %114 = arith.divf %112, %113 : vector<16x1xf32>
    %115 = vector.broadcast %107 : vector<16x1xf32> to vector<16x32xf32>
    %116 = arith.subf %103, %115 : vector<16x32xf32>
    %cst_40 = arith.constant 9.99999974E-6 : f32
    %117 = vector.broadcast %cst_40 : f32 to vector<16x1xf32>
    %118 = arith.addf %114, %117 : vector<16x1xf32>
    %119 = math.rsqrt %118 : vector<16x1xf32>
    %120 = vector.broadcast %119 : vector<16x1xf32> to vector<16x32xf32>
    %121 = arith.mulf %116, %120 : vector<16x32xf32>
    %122 = vector.broadcast %100 : vector<1x32xf32> to vector<16x32xf32>
    %123 = arith.mulf %121, %122 : vector<16x32xf32>
    %124 = vector.broadcast %102 : vector<1x32xf32> to vector<16x32xf32>
    %125 = arith.addf %123, %124 : vector<16x32xf32>
    %c0_41 = arith.constant 0 : index
    %c0_42 = arith.constant 0 : index
    %c0_43 = arith.constant 0 : index
    %126 = vector.load %arg6[%c0_41, %c0_42, %c0_43] : memref<1x32x128xf32, #tpu.memory_space<vmem>>, vector<1x32x128xf32>
    %127 = vector.shape_cast %126 : vector<1x32x128xf32> to vector<32x128xf32>
    %cst_44 = arith.constant dense<0.000000e+00> : vector<16x128xf32>
    %128 = tpu.matmul %125, %127, %cst_44 {dimension_numbers = #tpu.dot_dimension_numbers<[1], [0], [0], [1], [0, 0, 1, 1], [], []>} : vector<16x32xf32>, vector<32x128xf32>, vector<16x128xf32> -> vector<16x128xf32>
    %c0_45 = arith.constant 0 : index
    %c0_46 = arith.constant 0 : index
    %c0_47 = arith.constant 0 : index
    %129 = vector.load %arg7[%c0_45, %c0_46, %c0_47] : memref<1x1x128xf32, #tpu.memory_space<vmem>>, vector<1x1x128xf32>
    %130 = vector.shape_cast %129 : vector<1x1x128xf32> to vector<1x128xf32>
    %131 = vector.broadcast %130 : vector<1x128xf32> to vector<16x128xf32>
    %132 = arith.addf %128, %131 : vector<16x128xf32>
    %cst_48 = arith.constant 0.000000e+00 : f32
    %133 = vector.broadcast %cst_48 : f32 to vector<16x128xf32>
    %134 = arith.maximumf %132, %133 : vector<16x128xf32>
    %c0_49 = arith.constant 0 : index
    %c3 = arith.constant 3 : index
    %c0_50 = arith.constant 0 : index
    %135 = vector.load %arg9[%c0_49, %c3, %c0_50] : memref<1x6x32xf32, #tpu.memory_space<vmem>>, vector<1x1x32xf32>
    %136 = vector.shape_cast %135 : vector<1x1x32xf32> to vector<1x32xf32>
    %c0_51 = arith.constant 0 : index
    %c0_52 = arith.constant 0 : index
    %c0_53 = arith.constant 0 : index
    %137 = vector.load %arg8[%c0_51, %c0_52, %c0_53] : memref<1x128x32xf32, #tpu.memory_space<vmem>>, vector<1x128x32xf32>
    %138 = vector.shape_cast %137 : vector<1x128x32xf32> to vector<128x32xf32>
    %cst_54 = arith.constant dense<0.000000e+00> : vector<16x32xf32>
    %139 = tpu.matmul %134, %138, %cst_54 {dimension_numbers = #tpu.dot_dimension_numbers<[1], [0], [0], [1], [0, 0, 1, 1], [], []>} : vector<16x128xf32>, vector<128x32xf32>, vector<16x32xf32> -> vector<16x32xf32>
    %140 = vector.broadcast %136 : vector<1x32xf32> to vector<16x32xf32>
    %141 = arith.addf %139, %140 : vector<16x32xf32>
    %c0_55 = arith.constant 0 : index
    %c4 = arith.constant 4 : index
    %c0_56 = arith.constant 0 : index
    %142 = vector.load %arg9[%c0_55, %c4, %c0_56] : memref<1x6x32xf32, #tpu.memory_space<vmem>>, vector<1x1x32xf32>
    %143 = vector.shape_cast %142 : vector<1x1x32xf32> to vector<1x32xf32>
    %c0_57 = arith.constant 0 : index
    %c5 = arith.constant 5 : index
    %c0_58 = arith.constant 0 : index
    %144 = vector.load %arg9[%c0_57, %c5, %c0_58] : memref<1x6x32xf32, #tpu.memory_space<vmem>>, vector<1x1x32xf32>
    %145 = vector.shape_cast %144 : vector<1x1x32xf32> to vector<1x32xf32>
    %146 = arith.addf %141, %125 : vector<16x32xf32>
    %cst_59 = arith.constant dense<0.000000e+00> : vector<16xf32>
    %147 = vector.multi_reduction <add>, %146, %cst_59 [1] : vector<16x32xf32> to vector<16xf32>
    %148 = vector.shape_cast %147 : vector<16xf32> to vector<16x1xf32>
    %cst_60 = arith.constant 3.200000e+01 : f32
    %149 = vector.broadcast %cst_60 : f32 to vector<16x1xf32>
    %150 = arith.divf %148, %149 : vector<16x1xf32>
    %151 = vector.broadcast %150 : vector<16x1xf32> to vector<16x32xf32>
    %152 = arith.subf %146, %151 : vector<16x32xf32>
    %153 = arith.mulf %152, %152 : vector<16x32xf32>
    %cst_61 = arith.constant dense<0.000000e+00> : vector<16xf32>
    %154 = vector.multi_reduction <add>, %153, %cst_61 [1] : vector<16x32xf32> to vector<16xf32>
    %155 = vector.shape_cast %154 : vector<16xf32> to vector<16x1xf32>
    %cst_62 = arith.constant 3.200000e+01 : f32
    %156 = vector.broadcast %cst_62 : f32 to vector<16x1xf32>
    %157 = arith.divf %155, %156 : vector<16x1xf32>
    %158 = vector.broadcast %150 : vector<16x1xf32> to vector<16x32xf32>
    %159 = arith.subf %146, %158 : vector<16x32xf32>
    %cst_63 = arith.constant 9.99999974E-6 : f32
    %160 = vector.broadcast %cst_63 : f32 to vector<16x1xf32>
    %161 = arith.addf %157, %160 : vector<16x1xf32>
    %162 = math.rsqrt %161 : vector<16x1xf32>
    %163 = vector.broadcast %162 : vector<16x1xf32> to vector<16x32xf32>
    %164 = arith.mulf %159, %163 : vector<16x32xf32>
    %165 = vector.broadcast %143 : vector<1x32xf32> to vector<16x32xf32>
    %166 = arith.mulf %164, %165 : vector<16x32xf32>
    %167 = vector.broadcast %145 : vector<1x32xf32> to vector<16x32xf32>
    %168 = arith.addf %166, %167 : vector<16x32xf32>
    %c1_i32 = arith.constant 1 : i32
    %169 = arith.cmpi slt, %arg1, %c1_i32 : i32
    %170 = arith.extui %169 : i1 to i32
    %c0_i32_64 = arith.constant 0 : i32
    %171 = arith.cmpi ne, %170, %c0_i32_64 : i32
    scf.if %171 {
      %c0_67 = arith.constant 0 : index
      %c0_68 = arith.constant 0 : index
      %175 = vector.load %arg13[%c0_67, %c0_68] : memref<16x32xf32, #tpu.memory_space<vmem>>, vector<16x32xf32>
      tpu.vector_store %arg13[%c0_67, %c0_68], %168 {strides = array<i32>} : memref<16x32xf32, #tpu.memory_space<vmem>>, vector<16x32xf32>,
    } else {
    }
    %c1_i32_65 = arith.constant 1 : i32
    %172 = arith.cmpi eq, %arg1, %c1_i32_65 : i32
    %173 = arith.extui %172 : i1 to i32
    %c0_i32_66 = arith.constant 0 : i32
    %174 = arith.cmpi ne, %173, %c0_i32_66 : i32
    scf.if %174 {
      %175 = vector.shape_cast %168 : vector<16x32xf32> to vector<2x8x32xf32>
      %cst_67 = arith.constant dense<0.000000e+00> : vector<2x32xf32>
      %176 = vector.multi_reduction <add>, %175, %cst_67 [1] : vector<2x8x32xf32> to vector<2x32xf32>
      %cst_68 = arith.constant 8.000000e+00 : f32
      %177 = vector.broadcast %cst_68 : f32 to vector<2x32xf32>
      %178 = arith.divf %176, %177 : vector<2x32xf32>
      %c0_69 = arith.constant 0 : index
      %c0_70 = arith.constant 0 : index
      %179 = vector.load %arg10[%c0_69, %c0_70] : memref<32x128xf32, #tpu.memory_space<vmem>>, vector<32x128xf32>
      %cst_71 = arith.constant dense<0.000000e+00> : vector<2x128xf32>
      %180 = tpu.matmul %178, %179, %cst_71 {dimension_numbers = #tpu.dot_dimension_numbers<[1], [0], [0], [1], [0, 0, 1, 1], [], []>} : vector<2x32xf32>, vector<32x128xf32>, vector<2x128xf32> -> vector<2x128xf32>
      %c0_72 = arith.constant 0 : index
      %c0_73 = arith.constant 0 : index
      %181 = vector.load %arg11[%c0_72, %c0_73] : memref<1x128xf32, #tpu.memory_space<vmem>>, vector<1x128xf32>
      %182 = vector.broadcast %181 : vector<1x128xf32> to vector<2x128xf32>
      %183 = arith.addf %180, %182 : vector<2x128xf32>
      %cst_74 = arith.constant dense<0xFF800000> : vector<2xf32>
      %184 = vector.multi_reduction <maximumf>, %183, %cst_74 [1] : vector<2x128xf32> to vector<2xf32>
      %185 = vector.shape_cast %184 : vector<2xf32> to vector<2x1xf32>
      %186 = vector.broadcast %185 : vector<2x1xf32> to vector<2x128xf32>
      %187 = arith.subf %183, %186 : vector<2x128xf32>
      %188 = math.exp %187 : vector<2x128xf32>
      %cst_75 = arith.constant dense<0.000000e+00> : vector<2xf32>
      %189 = vector.multi_reduction <add>, %188, %cst_75 [1] : vector<2x128xf32> to vector<2xf32>
      %190 = vector.shape_cast %189 : vector<2xf32> to vector<2x1xf32>
      %191 = math.log %190 : vector<2x1xf32>
      %192 = arith.addf %185, %191 : vector<2x1xf32>
      %193 = vector.broadcast %192 : vector<2x1xf32> to vector<2x128xf32>
      %194 = arith.subf %183, %193 : vector<2x128xf32>
      %c0_76 = arith.constant 0 : index
      %c0_77 = arith.constant 0 : index
      %195 = vector.load %arg12[%c0_76, %c0_77] : memref<2x128xf32, #tpu.memory_space<vmem>>, vector<2x128xf32>
      tpu.vector_store %arg12[%c0_76, %c0_77], %194 {strides = array<i32>} : memref<2x128xf32, #tpu.memory_space<vmem>>, vector<2x128xf32>,
    } else {
    }
    return
  }
  func.func @transform_0(%arg0: i32, %arg1: i32) -> (i32, i32, i32) {
    %c0_i32 = arith.constant 0 : i32
    %c0_i32_0 = arith.constant 0 : i32
    %c0_i32_1 = arith.constant 0 : i32
    return %arg0, %c0_i32, %c0_i32_0 : i32, i32, i32
  }
  func.func @transform_1(%arg0: i32, %arg1: i32) -> (i32, i32) {
    %c0_i32 = arith.constant 0 : i32
    %c0_i32_0 = arith.constant 0 : i32
    %c0_i32_1 = arith.constant 0 : i32
    return %c0_i32, %c0_i32_0 : i32, i32
  }
  func.func @transform_2(%arg0: i32, %arg1: i32) -> (i32, i32, i32) {
    %c0_i32 = arith.constant 0 : i32
    %c0_i32_0 = arith.constant 0 : i32
    %c0_i32_1 = arith.constant 0 : i32
    return %arg1, %c0_i32, %c0_i32_0 : i32, i32, i32
  }
  func.func @transform_3(%arg0: i32, %arg1: i32) -> (i32, i32, i32) {
    %c0_i32 = arith.constant 0 : i32
    %c0_i32_0 = arith.constant 0 : i32
    %c0_i32_1 = arith.constant 0 : i32
    return %arg1, %c0_i32, %c0_i32_0 : i32, i32, i32
  }
  func.func @transform_4(%arg0: i32, %arg1: i32) -> (i32, i32, i32) {
    %c0_i32 = arith.constant 0 : i32
    %c0_i32_0 = arith.constant 0 : i32
    %c0_i32_1 = arith.constant 0 : i32
    return %arg1, %c0_i32, %c0_i32_0 : i32, i32, i32
  }
  func.func @transform_5(%arg0: i32, %arg1: i32) -> (i32, i32, i32) {
    %c0_i32 = arith.constant 0 : i32
    %c0_i32_0 = arith.constant 0 : i32
    %c0_i32_1 = arith.constant 0 : i32
    return %arg1, %c0_i32, %c0_i32_0 : i32, i32, i32
  }
  func.func @transform_6(%arg0: i32, %arg1: i32) -> (i32, i32, i32) {
    %c0_i32 = arith.constant 0 : i32
    %c0_i32_0 = arith.constant 0 : i32
    %c0_i32_1 = arith.constant 0 : i32
    return %arg1, %c0_i32, %c0_i32_0 : i32, i32, i32
  }
  func.func @transform_7(%arg0: i32, %arg1: i32) -> (i32, i32, i32) {
    %c0_i32 = arith.constant 0 : i32
    %c0_i32_0 = arith.constant 0 : i32
    %c0_i32_1 = arith.constant 0 : i32
    return %arg1, %c0_i32, %c0_i32_0 : i32, i32, i32
  }
  func.func @transform_8(%arg0: i32, %arg1: i32) -> (i32, i32) {
    %c0_i32 = arith.constant 0 : i32
    %c0_i32_0 = arith.constant 0 : i32
    %c0_i32_1 = arith.constant 0 : i32
    return %c0_i32, %c0_i32_0 : i32, i32
  }
  func.func @transform_9(%arg0: i32, %arg1: i32) -> (i32, i32) {
    %c0_i32 = arith.constant 0 : i32
    %c0_i32_0 = arith.constant 0 : i32
    %c0_i32_1 = arith.constant 0 : i32
    return %c0_i32, %c0_i32_0 : i32, i32
  }
  func.func @transform_10(%arg0: i32, %arg1: i32) -> (i32, i32) {
    %c0_i32 = arith.constant 0 : i32
    %c0_i32_0 = arith.constant 0 : i32
    return %arg0, %c0_i32 : i32, i32
  }
}

</mosaic_0001>

<bundles_post_ra>
// kernel: tpu_custom_call.1
= control target key start
LH: loop header
LB: loop body
LE: loop exit
PB: predicated region body
PF: predicated region fallthrough
CT: control target
= control target key end

     0   :  { %s2153_s0 = inlined_call_operand.vmem [shape: f32[2,8,32], index: 0, kind: input, shape index: {}]   ;;  %s2154_s1 = inlined_call_operand.vmem [shape: f32[8,32], index: 1, kind: input, shape index: {}]   ;;  %s2155_s2 = inlined_call_operand.vmem [shape: f32[2,32,384], index: 2, kind: input, shape index: {}]   ;;  %s2156_s3 = inlined_call_operand.vmem [shape: f32[2,128,32], index: 3, kind: input, shape index: {}]   ;;  %s2157_s4 = inlined_call_operand.vmem [shape: f32[2,32,128], index: 4, kind: input, shape index: {}]   ;;  %s2158_s5 = inlined_call_operand.vmem [shape: f32[2,1,128], index: 5, kind: input, shape index: {}]   ;;  %s2159_s6 = inlined_call_operand.vmem [shape: f32[2,128,32], index: 6, kind: input, shape index: {}]   ;;  %s2160_s7 = inlined_call_operand.vmem [shape: f32[2,6,32], index: 7, kind: input, shape index: {}]   ;;  %s2161_s8 = inlined_call_operand.vmem [shape: f32[32,128], index: 8, kind: input, shape index: {}]   ;;  %s2162_s9 = inlined_call_operand.vmem [shape: f32[1,128], index: 9, kind: input, shape index: {}]   ;;  %s2163_s10 = inlined_call_operand.hbm [shape: f32[2,128], index: 10, kind: output, shape index: {}]  }
   0x1   :  { %2165 = sst [smem:[#allocation8_spill]] %s2156_s3 }
   0x2   :  { %2166 = sst [smem:[#allocation9_spill]] %s2163_s10 }
   0x3   :  { %15 = vsyncpa [#allocation4], 0  ;;  %s1853_s13 = smov 0   ;;  %s1855_s14 = smov 0  }
   0x4   :  { %s1857_s15 = smov 0  }
   0x5 LB: > { %2167 = sst [smem:[#allocation6_spill]] %s1786_s14  ;;  %s30_s17 = sadd.s32 1, %s1786_s14  ;;  %s1790_s15 = sphi %s1857_s15, %s21_s15   ;;  %s1786_s14 = sphi %s1855_s14, %s2173_s14   ;;  %s1782_s13 = sphi %s1853_s13, %s2172_s13  }
   0x6   : > { %p31_p0 = scmp.ge.s32.totalorder %s30_s17, 2  ;;  %p1586_p1 = scmp.ge.s32.totalorder %s1790_s15, 1 }
   0x7   : > { %p383_p2 = scmp.lt.s32.totalorder %s1790_s15, 3 }
   0x8   : > { %s2175_s17 = smov (%p31_p0, %s30_s17), 0 }
   0x9   : > { %2168 = sst [smem:[#allocation7_spill]] %s2175_s17  ;;  %p384_p3 = pnand %p1586_p1, %p383_p2 }
   0xa   : > { %p449_p4 = scmp.lt.s32.totalorder (!%p384_p3), %s1782_s13, 1  ;;  %s2169_s3 = sld [smem:[#allocation8_spill]] (!%p384_p3) }
   0xb   : > { %387 = sbr.rel (%p384_p3) target bundleno = 2678 (0xa76), region = 60  ;;  %p1595_p5 = scmp.ne.s32.totalorder (!%p384_p3), %s1782_s13, 0 }
  0x10   : > { %s1876_s18 = scalar_select %p449_p4, %s1782_s13, 1 }
  0x12   : > { %s1638_s19 = smul.u32 96, %s1876_s18  ;;  %s1635_s20 = sshll.u32 %s1876_s18, 7 }
  0x13   : > { %s1883_s23 = scalar_lea.vmem %s2169_s3, %s1635_s20  ;;  %s1636_s24 = sshll.u32 %s1876_s18, 5 }
  0x14   : > { %s1889_s27 = scalar_lea.vmem %s2155_s2, %s1638_s19  ;;  %s1894_s30 = scalar_lea.vmem %s2157_s4, %s1636_s24 }
  0x15   : > { %s466_s16 = scalar_lea.vmem %s2158_s5, %s1876_s18  ;;  %s1903_s21 = scalar_lea.vmem %s2159_s6, %s1635_s20 }
  0x16   : > { %s1594_s22 = sshll.u32 %s1876_s18, 3  ;;  %479 = sbr.rel (%p1595_p5) target bundleno = 33 (0x21), region = 64 }
  0x17   : > { %s1909_s19 = scalar_lea.vmem %s2160_s7, %s1594_s22 }
  0x1b   : > { %v480_v0 = vld [vmem:[%s2153_s0] sm:$0xff]  ;;  %vm485_vm0 = vcmask 261120   ;;  %v481_v2 = vld [vmem:[%s2153_s0 + $0x8] sm:$0xff] }
  0x1c   : > { %v482_v1 = vld [vmem:[%s2154_s1] sm:$0xff] }
  0x1d   : > { %v483_v3 = vadd.f32 %v482_v1, %v480_v0  ;;  %v484_v4 = vadd.f32 %v482_v1, %v481_v2 }
  0x1f   : > { %486 = vst.msk [vmem:[#allocation2] sm:$0xff] %vm485_vm0, %v483_v3 }
  0x20   : > { %487 = vst.msk [vmem:[#allocation2 + $0x8] sm:$0xff] %vm485_vm0, %v484_v4 }
  0x21 PF: > { %v499_v5 = vld [vmem:[%s1889_s27 + $0x48] sm:$0xff]  ;;  %v496_v6 = vld [vmem:[%s1889_s27 + $0x30] sm:$0xff]  ;;  %v493_v7 = vld [vmem:[%s1889_s27 + $0x18] sm:$0xff]  ;;  %vm502_vm1 = vcmask 261120   ;;  %s1792_s3 = smov 96   ;;  %s1793_s10 = smov 64  }
  0x22   : > { %521 = vmatpush.msra.mxu0 %v499_v5  ;;  %v490_v8 = vld [vmem:[%s1889_s27] sm:$0xff]  ;;  %v501_v9 = vld [vmem:[%s1889_s27 + $0x58] sm:$0xff]  ;;  %v500_v12 = vld [vmem:[%s1889_s27 + $0x50] sm:$0xff]  ;;  %s1794_s20 = smov 32   ;;  %vm632_vm2 = vcmask 64512   ;;  %vm1125_vm3 = vcmask 523264  }
  0x23   : > { %v498_v10 = vld [vmem:[%s1889_s27 + $0x40] sm:$0xff]  ;;  %567 = vmatpush.msra.mxu2 %v501_v9  ;;  %v495_v13 = vld [vmem:[%s1889_s27 + $0x28] sm:$0xff]  ;;  %v492_v14 = vld [vmem:[%s1889_s27 + $0x10] sm:$0xff]  ;;  %vm1128_vm4 = vcmask 785408   ;;  %p1628_p6 = scmp.ge.s32.totalorder %s1782_s13, 1 }
  0x24   : > { %522 = vmatpush.msra.mxu0 %v496_v6  ;;  %v497_v15 = vld [vmem:[%s1889_s27 + $0x38] sm:$0xff]  ;;  %v494_v16 = vld [vmem:[%s1889_s27 + $0x20] sm:$0xff]  ;;  %v491_v17 = vld [vmem:[%s1889_s27 + $0x8] sm:$0xff] }
  0x25   : > { %568 = vmatpush.msra.mxu2 %v498_v10 }
  0x26   : > { %v1927_v11 = vld [vmem:[#allocation2] sm:$0xff]  ;;  %523 = vmatpush.msra.mxu0 %v493_v7 }
  0x27   : > { %569 = vmatpush.msra.mxu2 %v495_v13  ;;  %v1939_v18 = vld [vmem:[#allocation2 + $0x8] sm:$0xff] }
  0x28   : > { %524 = vmatpush.msra.mxu0 %v490_v8 }
  0x29   : > { %1596 = vmatmul.msk.f32.vlgmr.msra.gmra.mxu0 %vm502_vm1, %v1927_v11  ;;  %570 = vmatpush.msra.mxu2 %v492_v14 }
  0x2a   : > { %544 = vmatpush.msrb.mxu0 %v500_v12  ;;  %1600 = vmatmul.msk.f32.vlgmr.msra.gmra.mxu2 %vm502_vm1, %v1927_v11 }
  0x2c   : > { %545 = vmatpush.msrb.mxu0 %v497_v15 }
  0x2e   : > { %546 = vmatpush.msrb.mxu0 %v494_v16 }
  0x30   : > { %547 = vmatpush.msrb.mxu0 %v491_v17 }
  0x31   : > { %1597 = vmatmul.msk.f32.gmra.mxu0 %vm502_vm1, %v1939_v18 }
  0x32   : > { %1601 = vmatmul.msk.f32.gmra.mxu2 %vm502_vm1, %v1939_v18 }
  0x39   : > { %1598 = vmatmul.msk.f32.vlgmr.msrb.gmra.mxu0 %vm502_vm1, %v1927_v11 }
  0x41   : > { %1599 = vmatmul.msk.f32.gmra.mxu0 %vm502_vm1, %v1939_v18 }
  0xa6   : > { %v526_v19 = vpop.f32.mrf.mxu0 }
  0xa7   : > { %701 = vrot.lane.b32.xlu1 %v526_v19, %s1792_s3 }
  0xad   : > { %v1967_v23 = vpop.f32.mrf.mxu2 }
  0xae   : > { %v1950_v20 = vpop.f32.mrf.mxu0  ;;  %673 = vmatpush.msra.mxu3 %v1967_v23 }
  0xb5   : > { %v1970_v24 = vpop.f32.mrf.mxu2 }
  0xb6   : > { %v549_v21 = vpop.f32.mrf.mxu0  ;;  %696 = vmatpush.msra.mxu1 %v1970_v24 }
  0xb7   : > { %837 = vrot.lane.b32.xlu2 %v549_v21, %s1793_s10  ;;  %703 = vrot.lane.b32.xlu1 %v549_v21, %s1792_s3 }
  0xb8   : > { %1602 = vmatpush.xpose.msk.msra.mxu0 %vm502_vm1, %v549_v21 }
  0xbb   : > { %1603 = vmatmul.msk.f32.vlgmr.msra.gmra.mxu0 %vm502_vm1, %v526_v19 }
  0xbe   : > { %v552_v22 = vpop.f32.mrf.mxu0 }
  0xbf   : > { %835 = vrot.lane.b32.xlu1 %v526_v19, %s1793_s10  ;;  %731 = vrot.lane.b32.xlu2 %v552_v22, %s1792_s3 }
  0xc0   : > { %1604 = vmatpush.xpose.msk.msrb.mxu2 %vm502_vm1, %v552_v22 }
  0xc3   : > { %1605 = vmatmul.msk.f32.vlgmr.msrb.gmra.mxu2 %vm502_vm1, %v1950_v20 }
  0xc7   : > { %969 = vrot.lane.b32.xlu1 %v549_v21, %s1794_s20  ;;  %865 = vrot.lane.b32.xlu2 %v552_v22, %s1793_s10  ;;  %v1675_v21 = vpack.i.bf16 %v1970_v24, %v1967_v23 }
  0xcf   : > { %967 = vrot.lane.b32.xlu1 %v526_v19, %s1794_s20  ;;  %863 = vrot.lane.b32.xlu2 %v1950_v20, %s1793_s10 }
  0xd7   : > { %997 = vrot.lane.b32.xlu2 %v552_v22, %s1794_s20 }
 0x111   : > { %v838_v25 = vpop.permute.xlu2 %837 }
 0x119   : > { %v732_v26 = vpop.permute.xlu2 %731  ;;  %v702_v27 = vpop.permute.xlu1 %701 }
 0x11a   : > { %1610 = vmatpush.xpose.msk.msra.mxu2 %vm502_vm1, %v732_v26 }
 0x121   : > { %v866_v28 = vpop.permute.xlu2 %865 }
 0x122   : > { %1616 = vmatpush.xpose.msk.msrb.mxu2 %vm502_vm1, %v866_v28 }
 0x129   : > { %v704_v29 = vpop.permute.xlu1 %703  ;;  %v864_v47 = vpop.permute.xlu2 %863 }
 0x12a   : > { %1608 = vmatpush.xpose.msk.msrb.mxu1 %vm502_vm1, %v704_v29 }
 0x131   : > { %v836_v36 = vpop.permute.xlu1 %835  ;;  %v998_v51 = vpop.permute.xlu2 %997 }
 0x138   : > { %v601_v30 = vpop.f32.mrf.mxu0 }
 0x139   : > { %v630_v31 = vmul.f32 0.17677669, %v601_v30  ;;  %v970_v37 = vpop.permute.xlu1 %969 }
 0x13b   : > { %v633_v32 = vsel %vm632_vm2, %v630_v31, -inf }
 0x13c   : > { %634 = vmax.xlane.f32.xlu1 %v633_v32 }
 0x141   : > { %v968_v38 = vpop.permute.xlu1 %967 }
 0x146   : > { %v627_v33 = vpop.f32.mrf.mxu2 }
 0x147   : > { %v631_v34 = vmul.f32 0.17677669, %v627_v33 }
 0x149   : > { %v636_v35 = vsel %vm632_vm2, %v631_v34, -inf }
 0x14a   : > { %637 = vmax.xlane.f32.xlu0 %v636_v35 }
 0x15e   : > { %729 = vrot.lane.b32.xlu0 %v1950_v20, %s1792_s3 }
 0x1af   : > { %v635_v39 = vpop.xlane.xlu1 %634 }
 0x1b0   : > { %v639_v40 = vsub.f32 %v630_v31, %v635_v39 }
 0x1b2   : > { %v641_v41 = vmul.f32 1.442695, %v639_v40 }
 0x1b4   : > { %1687 = vpow2.f32 %v641_v41 }
 0x1ba   : > { %v1688_v42 = vpop.eup %1687 }
 0x1bb   : > { %v645_v43 = vsel %vm632_vm2, %v1688_v42, 0.0 }
 0x1bc   : > { %646 = vadd.xlane.f32.xlu1 %v645_v43 }
 0x1bd   : > { %v638_v44 = vpop.xlane.xlu0 %637 }
 0x1be   : > { %v640_v45 = vsub.f32 %v631_v34, %v638_v44 }
 0x1c0   : > { %v643_v46 = vmul.f32 1.442695, %v640_v45 }
 0x1c2   : > { %1689 = vpow2.f32 %v643_v46 }
 0x1c8   : > { %v1690_v48 = vpop.eup %1689 }
 0x1c9   : > { %v648_v49 = vsel %vm632_vm2, %v1690_v48, 0.0 }
 0x1ca   : > { %649 = vadd.xlane.f32.xlu0 %v648_v49 }
 0x1d0   : > { %v730_v50 = vpop.permute.xlu0 %729 }
 0x1d1   : > { %1611 = vmatmul.msk.f32.vlgmr.msra.gmra.mxu2 %vm502_vm1, %v730_v50 }
 0x1d2   : > { %1622 = vmatpush.xpose.msk.msra.mxu2 %vm502_vm1, %v998_v51 }
 0x1d9   : > { %1617 = vmatmul.msk.f32.vlgmr.msrb.gmra.mxu2 %vm502_vm1, %v864_v47 }
 0x1de   : > { %995 = vrot.lane.b32.xlu0 %v1950_v20, %s1794_s20 }
 0x22f   : > { %v647_v52 = vpop.xlane.xlu1 %646 }
 0x230   : > { %1691 = vrcp.f32 %v647_v52 }
 0x236   : > { %v1692_v53 = vpop.eup %1691 }
 0x237   : > { %v653_v54 = vmul.f32 %v1692_v53, %v1688_v42 }
 0x239   : > { %1606 = vmatmul.msk.f32.vlgmr.msra.gmra.mxu3 %vm632_vm2, %v653_v54 }
 0x23d   : > { %v650_v55 = vpop.xlane.xlu0 %649 }
 0x23e   : > { %1693 = vrcp.f32 %v650_v55 }
 0x244   : > { %v1694_v56 = vpop.eup %1693 }
 0x245   : > { %v654_v57 = vmul.f32 %v1694_v56, %v1690_v48 }
 0x247   : > { %1607 = vmatmul.msk.f32.vlgmr.msra.gmra.mxu1 %vm632_vm2, %v654_v57 }
 0x248   : > { %1614 = vmatpush.xpose.msk.msra.mxu1 %vm502_vm1, %v838_v25 }
 0x24f   : > { %1609 = vmatmul.msk.f32.vlgmr.msrb.gmra.mxu1 %vm502_vm1, %v702_v27 }
 0x250   : > { %1620 = vmatpush.xpose.msk.msrb.mxu1 %vm502_vm1, %v970_v37  ;;  %v996_v58 = vpop.permute.xlu0 %995 }
 0x251   : > { %1623 = vmatmul.msk.f32.vlgmr.msra.gmra.mxu2 %vm502_vm1, %v996_v58 }
 0x254   : > { %v754_v59 = vpop.f32.mrf.mxu2 }
 0x255   : > { %v758_v3 = vmul.f32 0.17677669, %v754_v59 }
 0x257   : > { %1615 = vmatmul.msk.f32.vlgmr.msra.gmra.mxu1 %vm502_vm1, %v836_v36  ;;  %v762_v9 = vsel %vm632_vm2, %v758_v3, -inf }
 0x25c   : > { %v888_v60 = vpop.f32.mrf.mxu2 }
 0x25d   : > { %v892_v61 = vmul.f32 0.17677669, %v888_v60 }
 0x25f   : > { %1621 = vmatmul.msk.f32.vlgmr.msrb.gmra.mxu1 %vm502_vm1, %v968_v38  ;;  %v896_v62 = vsel %vm632_vm2, %v892_v61, -inf }
 0x260   : > { %897 = vmax.xlane.f32.xlu0 %v896_v62 }
 0x2c4   : > { %v1996_v63 = vpop.f32.mrf.mxu1 }
 0x2cc   : > { %v726_v0 = vpop.f32.mrf.mxu1 }
 0x2cd   : > { %v1998_v1 = vmul.f32 0.17677669, %v726_v0 }
 0x2cf   : > { %v759_v2 = vsel %vm632_vm2, %v1998_v1, -inf }
 0x2d0   : > { %760 = vmax.xlane.f32.xlu2 %v759_v2 }
 0x2d3   : > { %v898_v4 = vpop.xlane.xlu0 %897 }
 0x2d4   : > { %v860_v5 = vpop.f32.mrf.mxu1  ;;  %v900_v7 = vsub.f32 %v892_v61, %v898_v4  ;;  %v1020_v10 = vpop.f32.mrf.mxu2 }
 0x2d5   : > { %v891_v6 = vmul.f32 0.17677669, %v860_v5  ;;  %v1024_v13 = vmul.f32 0.17677669, %v1020_v10 }
 0x2d6   : > { %v903_v12 = vmul.f32 1.442695, %v900_v7 }
 0x2d7   : > { %v893_v8 = vsel %vm632_vm2, %v891_v6, -inf  ;;  %v1028_v16 = vsel %vm632_vm2, %v1024_v13, -inf }
 0x2d8   : > { %894 = vmax.xlane.f32.xlu0 %v893_v8  ;;  %763 = vmax.xlane.f32.xlu2 %v762_v9  ;;  %1695 = vpow2.f32 %v903_v12  ;;  %v675_v9 = vpop.f32.mrf.mxu3 }
 0x2dc   : > { %v992_v14 = vpop.f32.mrf.mxu1 }
 0x2dd   : > { %v1023_v15 = vmul.f32 0.17677669, %v992_v14 }
 0x2de   : > { %v2006_v19 = vpop.eup %1695 }
 0x2df   : > { %v1025_v17 = vsel %vm632_vm2, %v1023_v15, -inf  ;;  %v908_v20 = vsel %vm632_vm2, %v2006_v19, 0.0 }
 0x2e0   : > { %1029 = vmax.xlane.f32.xlu2 %v1028_v16  ;;  %1026 = vmax.xlane.f32.xlu1 %v1025_v17  ;;  %v1147_v17 = vld [vmem:[%s1883_s23 + $0x78] sm:$0xff] }
 0x2e1   : > { %1149 = vmatpush.msra.mxu1 %v1147_v17  ;;  %v1287_v17 = vld [vmem:[%s1903_s21 + $0x70] sm:$0xff] }
 0x2e8   : > { %909 = vadd.xlane.f32.xlu2 %v908_v20  ;;  %v1145_v20 = vld [vmem:[%s1883_s23 + $0x68] sm:$0xff] }
 0x2f9   : > { %1676 = vrot.lane.b32.xlu1 %v1675_v21, %s1792_s3  ;;  %v1144_v21 = vld [vmem:[%s1883_s23 + $0x60] sm:$0xff] }
 0x343   : > { %v761_v22 = vpop.xlane.xlu2 %760 }
 0x344   : > { %v765_v48 = vsub.f32 %v1998_v1, %v761_v22  ;;  %v1143_v22 = vld [vmem:[%s1883_s23 + $0x58] sm:$0xff] }
 0x346   : > { %v767_v49 = vmul.f32 1.442695, %v765_v48  ;;  %v1680_v48 = vld [vmem:[%s1909_s19] ss:$0 sm:$0xff] }
 0x34b   : > { %v764_v25 = vpop.xlane.xlu2 %763  ;;  %v895_v26 = vpop.xlane.xlu0 %894 }
 0x34c   : > { %v766_v27 = vsub.f32 %v758_v3, %v764_v25  ;;  %v899_v28 = vsub.f32 %v891_v6, %v895_v26  ;;  %v1142_v25 = vld [vmem:[%s1883_s23 + $0x50] sm:$0xff]  ;;  %v1141_v26 = vld [vmem:[%s1883_s23 + $0x48] sm:$0xff] }
 0x34e   : > { %v769_v29 = vmul.f32 1.442695, %v766_v27  ;;  %v901_v30 = vmul.f32 1.442695, %v899_v28  ;;  %v1140_v27 = vld [vmem:[%s1883_s23 + $0x40] sm:$0xff]  ;;  %v1139_v28 = vld [vmem:[%s1883_s23 + $0x38] sm:$0xff] }
 0x350   : > { %1697 = vpow2.f32 %v769_v29  ;;  %v1138_v29 = vld [vmem:[%s1883_s23 + $0x30] sm:$0xff] }
 0x351   : > { %1699 = vpow2.f32 %v901_v30  ;;  %v1137_v30 = vld [vmem:[%s1883_s23 + $0x28] sm:$0xff] }
 0x353   : > { %v1030_v31 = vpop.xlane.xlu2 %1029  ;;  %v1027_v32 = vpop.xlane.xlu1 %1026 }
 0x354   : > { %v1032_v33 = vsub.f32 %v1024_v13, %v1030_v31  ;;  %v1031_v34 = vsub.f32 %v1023_v15, %v1027_v32  ;;  %v1136_v31 = vld [vmem:[%s1883_s23 + $0x20] sm:$0xff]  ;;  %v1135_v32 = vld [vmem:[%s1883_s23 + $0x18] sm:$0xff] }
 0x356   : > { %v1698_v35 = vpop.eup %1697  ;;  %v1035_v36 = vmul.f32 1.442695, %v1032_v33  ;;  %v1033_v37 = vmul.f32 1.442695, %v1031_v34  ;;  %v1134_v33 = vld [vmem:[%s1883_s23 + $0x10] sm:$0xff]  ;;  %v1133_v34 = vld [vmem:[%s1883_s23 + $0x8] sm:$0xff] }
 0x357   : > { %v1700_v38 = vpop.eup %1699  ;;  %v774_v39 = vsel %vm632_vm2, %v1698_v35, 0.0 }
 0x358   : > { %1701 = vpow2.f32 %v1035_v36  ;;  %775 = vadd.xlane.f32.xlu0 %v774_v39  ;;  %v905_v40 = vsel %vm632_vm2, %v1700_v38, 0.0 }
 0x359   : > { %1703 = vpow2.f32 %v1033_v37  ;;  %906 = vadd.xlane.f32.xlu2 %v905_v40 }
 0x35a   : > { %1705 = vpow2.f32 %v767_v49 }
 0x35b   : > { %v910_v55 = vpop.xlane.xlu2 %909 }
 0x35e   : > { %v1702_v41 = vpop.eup %1701 }
 0x35f   : > { %v1704_v42 = vpop.eup %1703  ;;  %v1040_v43 = vsel %vm632_vm2, %v1702_v41, 0.0 }
 0x360   : > { %1041 = vadd.xlane.f32.xlu1 %v1040_v43  ;;  %v1037_v44 = vsel %vm632_vm2, %v1704_v42, 0.0  ;;  %v1706_v50 = vpop.eup %1705 }
 0x361   : > { %1038 = vadd.xlane.f32.xlu2 %v1037_v44  ;;  %v771_v51 = vsel %vm632_vm2, %v1706_v50, 0.0 }
 0x36b   : > { %v1677_v45 = vpop.permute.xlu1 %1676 }
 0x36c   : > { %v1679_v46 = vunpack.i.h.bf16 %v1677_v45  ;;  %915 = vrot.lane.b32.xlu0 %v1967_v23, %s1793_s10  ;;  %v1678_v47 = vunpack.i.l.bf16 %v1677_v45 }
 0x36e   : > { %803 = vmatpush.msrb.mxu3 %v1678_v47  ;;  %830 = vmatpush.msrb.mxu0 %v1679_v46 }
 0x379   : > { %1047 = vrot.lane.b32.xlu2 %v1967_v23, %s1794_s20 }
 0x396   : > { %772 = vadd.xlane.f32.xlu0 %v771_v51 }
 0x3aa   : > { %941 = vrot.lane.b32.xlu0 %v1970_v24, %s1793_s10 }
 0x3b2   : > { %1073 = vrot.lane.b32.xlu0 %v1970_v24, %s1794_s20 }
 0x3cb   : > { %v776_v52 = vpop.xlane.xlu0 %775 }
 0x3cc   : > { %1707 = vrcp.f32 %v776_v52  ;;  %v907_v56 = vpop.xlane.xlu2 %906 }
 0x3d2   : > { %v1708_v53 = vpop.eup %1707 }
 0x3d3   : > { %v780_v54 = vmul.f32 %v1708_v53, %v1698_v35  ;;  %v1042_v62 = vpop.xlane.xlu1 %1041  ;;  %v1132_v35 = vld [vmem:[%s1883_s23] sm:$0xff] }
 0x3d4   : > { %v1039_v57 = vpop.xlane.xlu2 %1038 }
 0x3d5   : > { %1613 = vmatmul.msk.f32.vlgmr.msrb.gmra.mxu0 %vm632_vm2, %v780_v54 }
 0x3dc   : > { %v1048_v61 = vpop.permute.xlu2 %1047 }
 0x3de   : > { %v916_v23 = vpop.permute.xlu0 %915 }
 0x3df   : > { %936 = vmatpush.msra.mxu3 %v916_v23 }
 0x409   : > { %v773_v58 = vpop.xlane.xlu0 %772 }
 0x40a   : > { %1709 = vrcp.f32 %v773_v58 }
 0x40b   : > { %1711 = vrcp.f32 %v907_v56 }
 0x40c   : > { %1713 = vrcp.f32 %v910_v55 }
 0x40d   : > { %1715 = vrcp.f32 %v1039_v57 }
 0x40e   : > { %1717 = vrcp.f32 %v1042_v62 }
 0x410   : > { %v1710_v59 = vpop.eup %1709 }
 0x411   : > { %v779_v60 = vmul.f32 %v1710_v59, %v1706_v50  ;;  %v1712_v24 = vpop.eup %1711 }
 0x412   : > { %v1714_v0 = vpop.eup %1713  ;;  %v913_v1 = vmul.f32 %v1712_v24, %v1700_v38 }
 0x413   : > { %1612 = vmatmul.msk.f32.vlgmr.msrb.gmra.mxu3 %vm632_vm2, %v779_v60  ;;  %v914_v2 = vmul.f32 %v1714_v0, %v2006_v19  ;;  %v1716_v4 = vpop.eup %1715  ;;  %v1146_v19 = vld [vmem:[%s1883_s23 + $0x70] sm:$0xff] }
 0x414   : > { %1068 = vmatpush.msrb.mxu3 %v1048_v61  ;;  %v1718_v5 = vpop.eup %1717  ;;  %v1045_v6 = vmul.f32 %v1716_v4, %v1704_v42  ;;  %1150 = vmatpush.msra.mxu1 %v1146_v19 }
 0x415   : > { %v1046_v7 = vmul.f32 %v1718_v5, %v1702_v41 }
 0x416   : > { %1151 = vmatpush.msra.mxu1 %v1145_v20  ;;  %v1286_v20 = vld [vmem:[%s1903_s21 + $0x68] sm:$0xff] }
 0x418   : > { %1152 = vmatpush.msra.mxu1 %v1144_v21 }
 0x41a   : > { %1153 = vmatpush.msra.mxu1 %v1143_v22 }
 0x41b   : > { %1618 = vmatmul.msk.f32.vlgmr.msra.gmra.mxu3 %vm632_vm2, %v913_v1 }
 0x41c   : > { %v942_v3 = vpop.permute.xlu0 %941  ;;  %1154 = vmatpush.msra.mxu1 %v1142_v25 }
 0x41d   : > { %962 = vmatpush.msra.mxu0 %v942_v3 }
 0x41e   : > { %1619 = vmatmul.msk.f32.vlgmr.msra.gmra.mxu0 %vm632_vm2, %v914_v2  ;;  %1155 = vmatpush.msra.mxu1 %v1141_v26  ;;  %v1285_v26 = vld [vmem:[%s1903_s21 + $0x60] sm:$0xff] }
 0x420   : > { %1156 = vmatpush.msra.mxu1 %v1140_v27 }
 0x422   : > { %1157 = vmatpush.msra.mxu1 %v1139_v28 }
 0x423   : > { %1624 = vmatmul.msk.f32.vlgmr.msrb.gmra.mxu3 %vm632_vm2, %v1045_v6  ;;  %v1236_v6 = vld [vmem:[%s1894_s30 + $0x18] sm:$0xff] }
 0x424   : > { %v1074_v8 = vpop.permute.xlu0 %1073  ;;  %1158 = vmatpush.msra.mxu1 %v1138_v29  ;;  %1259 = vmatpush.msrb.mxu2 %v1236_v6  ;;  %v1284_v29 = vld [vmem:[%s1903_s21 + $0x58] sm:$0xff] }
 0x425   : > { %1094 = vmatpush.msrb.mxu0 %v1074_v8  ;;  %v1234_v8 = vld [vmem:[%s1894_s30 + $0x8] sm:$0xff] }
 0x426   : > { %1625 = vmatmul.msk.f32.vlgmr.msrb.gmra.mxu0 %vm632_vm2, %v1046_v7  ;;  %1159 = vmatpush.msra.mxu1 %v1137_v30  ;;  %v1235_v7 = vld [vmem:[%s1894_s30 + $0x10] sm:$0xff] }
 0x427   : > { %1260 = vmatpush.msrb.mxu2 %v1235_v7 }
 0x428   : > { %1160 = vmatpush.msra.mxu1 %v1136_v31  ;;  %v1283_v31 = vld [vmem:[%s1903_s21 + $0x50] sm:$0xff] }
 0x429   : > { %1261 = vmatpush.msrb.mxu2 %v1234_v8 }
 0x42a   : > { %1161 = vmatpush.msra.mxu1 %v1135_v32  ;;  %v1681_v32 = vld [vmem:[%s1909_s19 + $0x1] ss:$0 sm:$0xff] }
 0x42c   : > { %1162 = vmatpush.msra.mxu1 %v1134_v33 }
 0x42e   : > { %1163 = vmatpush.msra.mxu1 %v1133_v34  ;;  %v1282_v34 = vld [vmem:[%s1903_s21 + $0x48] sm:$0xff] }
 0x430   : > { %1164 = vmatpush.msra.mxu1 %v1132_v35 }
 0x452   : > { %v832_v12 = vpop.f32.mrf.mxu0 }
 0x496   : > { %v805_v10 = vpop.f32.mrf.mxu3 }
 0x497   : > { %1101 = vrot.lane.b32.xlu2 %v805_v10, %s1794_s20 }
 0x49b   : > { %v964_v14 = vpop.f32.mrf.mxu0 }
 0x49e   : > { %v938_v13 = vpop.f32.mrf.mxu3 }
 0x49f   : > { %1109 = vrot.lane.b32.xlu0 %v938_v13, %s1793_s10 }
 0x4a3   : > { %v1096_v16 = vpop.f32.mrf.mxu0 }
 0x4a6   : > { %v1070_v15 = vpop.f32.mrf.mxu3 }
 0x4a7   : > { %1103 = vrot.lane.b32.xlu0 %v832_v12, %s1794_s20  ;;  %1117 = vrot.lane.b32.xlu2 %v1070_v15, %s1792_s3 }
 0x4af   : > { %1119 = vrot.lane.b32.xlu0 %v1096_v16, %s1792_s3  ;;  %1111 = vrot.lane.b32.xlu2 %v964_v14, %s1793_s10  ;;  %v1288_v16 = vld [vmem:[%s1903_s21 + $0x78] sm:$0xff] }
 0x4b0   : > { %1290 = vmatpush.msra.mxu3 %v1288_v16 }
 0x4b2   : > { %1291 = vmatpush.msra.mxu3 %v1287_v17 }
 0x4b4   : > { %1292 = vmatpush.msra.mxu3 %v1286_v20 }
 0x4b6   : > { %1293 = vmatpush.msra.mxu3 %v1285_v26 }
 0x4b8   : > { %1294 = vmatpush.msra.mxu3 %v1284_v29 }
 0x4ba   : > { %1295 = vmatpush.msra.mxu3 %v1283_v31 }
 0x4bc   : > { %1296 = vmatpush.msra.mxu3 %v1282_v34 }
 0x4f1   : > { %v1102_v36 = vpop.permute.xlu2 %1101 }
 0x4f2   : > { %v1123_v37 = vsel %vm502_vm1, %v675_v9, %v1102_v36  ;;  %v1233_v9 = vld [vmem:[%s1894_s30] sm:$0xff] }
 0x4f3   : > { %1262 = vmatpush.msrb.mxu2 %v1233_v9  ;;  %v1682_v36 = vld [vmem:[%s1909_s19 + $0x2] ss:$0 sm:$0xff] }
 0x501   : > { %v1118_v39 = vpop.permute.xlu2 %1117 }
 0x509   : > { %v1112_v44 = vpop.permute.xlu2 %1111 }
 0x511   : > { %v1110_v38 = vpop.permute.xlu0 %1109 }
 0x512   : > { %v1126_v40 = vsel %vm1125_vm3, %v1123_v37, %v1110_v38  ;;  %v1281_v37 = vld [vmem:[%s1903_s21 + $0x40] sm:$0xff] }
 0x513   : > { %v1129_v41 = vsel %vm1128_vm4, %v1126_v40, %v1118_v39  ;;  %v1280_v40 = vld [vmem:[%s1903_s21 + $0x38] sm:$0xff]  ;;  %1297 = vmatpush.msra.mxu3 %v1281_v37 }
 0x514   : > { %1165 = vmatmul.f32.vlgmr.msra.gmra.mxu1 %v1129_v41 }
 0x515   : > { %1298 = vmatpush.msra.mxu3 %v1280_v40 }
 0x519   : > { %v1104_v42 = vpop.permute.xlu0 %1103 }
 0x51a   : > { %v1124_v43 = vsel %vm502_vm1, %v1996_v63, %v1104_v42  ;;  %v1795_v63 = vmov 32.0  }
 0x51b   : > { %v1127_v46 = vsel %vm1125_vm3, %v1124_v43, %v1112_v44  ;;  %1719 = vrcp.f32 %v1795_v63  ;;  %v1279_v43 = vld [vmem:[%s1903_s21 + $0x30] sm:$0xff]  ;;  %v1273_v63 = vld [vmem:[%s1903_s21] sm:$0xff] }
 0x51c   : > { %1299 = vmatpush.msra.mxu3 %v1279_v43 }
 0x521   : > { %v1120_v45 = vpop.permute.xlu0 %1119  ;;  %v1720_v56 = vpop.eup %1719 }
 0x522   : > { %v1130_v47 = vsel %vm1128_vm4, %v1127_v46, %v1120_v45  ;;  %v1183_v57 = vmul.f32 32.0, %v1720_v56  ;;  %vm1187_vm5 = vweird.f32 %v1720_v56  ;;  %v1278_v45 = vld [vmem:[%s1903_s21 + $0x28] sm:$0xff] }
 0x523   : > { %1168 = vmatmul.f32.gmra.mxu1 %v1130_v47  ;;  %v1277_v47 = vld [vmem:[%s1903_s21 + $0x20] sm:$0xff]  ;;  %1300 = vmatpush.msra.mxu3 %v1278_v45 }
 0x524   : > { %v1184_v58 = vsub.f32 1.0, %v1183_v57 }
 0x525   : > { %1301 = vmatpush.msra.mxu3 %v1277_v47 }
 0x526   : > { %v1185_v59 = vmul.f32 %v1720_v56, %v1184_v58 }
 0x528   : > { %v1186_v60 = vadd.f32 %v1720_v56, %v1185_v59 }
 0x591   : > { %v1166_v49 = vpop.f32.mrf.mxu1 }
 0x592   : > { %v1167_v50 = vadd.f32 %v1680_v48, %v1166_v49  ;;  %v1276_v49 = vld [vmem:[%s1903_s21 + $0x18] sm:$0xff] }
 0x593   : > { %1302 = vmatpush.msra.mxu3 %v1276_v49 }
 0x594   : > { %v1174_v51 = vadd.f32 %v1167_v50, %v1927_v11  ;;  %v2064_v11 = vsel %vm1187_vm5, %v1720_v56, %v1186_v60  ;;  %v1683_v56 = vld [vmem:[%s466_s16] ss:$0 sm:$0xff] }
 0x596   : > { %v1176_v52 = vsel %vm502_vm1, %v1174_v51, 0.0 }
 0x597   : > { %1177 = vadd.xlane.f32.xlu1 %v1176_v52 }
 0x5a0   : > { %v1169_v53 = vpop.f32.mrf.mxu1 }
 0x5a1   : > { %v1170_v54 = vadd.f32 %v1680_v48, %v1169_v53 }
 0x5a3   : > { %v1175_v23 = vadd.f32 %v1170_v54, %v1939_v18 }
 0x5a5   : > { %v1179_v55 = vsel %vm502_vm1, %v1175_v23, 0.0 }
 0x5a6   : > { %1180 = vadd.xlane.f32.xlu2 %v1179_v55  ;;  %v1274_v55 = vld [vmem:[%s1903_s21 + $0x8] sm:$0xff] }
 0x60a   : > { %v1178_v61 = vpop.xlane.xlu1 %1177 }
 0x60b   : > { %v1189_v24 = vmul.f32 %v2064_v11, %v1178_v61 }
 0x60d   : > { %v1191_v18 = vsub.f32 %v1174_v51, %v1189_v24 }
 0x60f   : > { %v1193_v62 = vmul.f32 %v1191_v18, %v1191_v18 }
 0x611   : > { %v1195_v0 = vsel %vm502_vm1, %v1193_v62, 0.0 }
 0x612   : > { %1196 = vadd.xlane.f32.xlu0 %v1195_v0 }
 0x619   : > { %v1181_v1 = vpop.xlane.xlu2 %1180 }
 0x61a   : > { %v1190_v2 = vmul.f32 %v2064_v11, %v1181_v1 }
 0x61c   : > { %v2069_v3 = vsub.f32 %v1175_v23, %v1190_v2  ;;  %v1275_v23 = vld [vmem:[%s1903_s21 + $0x10] sm:$0xff] }
 0x61d   : > { %1303 = vmatpush.msra.mxu3 %v1275_v23 }
 0x61e   : > { %v1194_v4 = vmul.f32 %v2069_v3, %v2069_v3 }
 0x61f   : > { %1304 = vmatpush.msra.mxu3 %v1274_v55 }
 0x620   : > { %v1198_v5 = vsel %vm502_vm1, %v1194_v4, 0.0 }
 0x621   : > { %1199 = vadd.xlane.f32.xlu1 %v1198_v5  ;;  %1305 = vmatpush.msra.mxu3 %v1273_v63 }
 0x685   : > { %v1197_v10 = vpop.xlane.xlu0 %1196 }
 0x686   : > { %v1201_v12 = vmul.f32 %v1197_v10, %v2064_v11 }
 0x688   : > { %v1203_v13 = vadd.f32 1e-05, %v1201_v12 }
 0x68a   : > { %1721 = vrsqrt.f32 %v1203_v13  ;;  %vm1211_vm7 = vweird.f32 %v1203_v13 }
 0x690   : > { %v1722_v14 = vpop.eup %1721 }
 0x691   : > { %v1206_v15 = vmul.f32 %v1722_v14, %v1203_v13  ;;  %vm1212_vm6 = vweird.f32 %v1722_v14 }
 0x692   : > { %vm1213_vm8 = vmor %vm1211_vm7, %vm1212_vm6 }
 0x693   : > { %v1207_v19 = vmul.f32 %v1722_v14, %v1206_v15 }
 0x694   : > { %v1200_v21 = vpop.xlane.xlu1 %1199 }
 0x695   : > { %v1208_v22 = vmul.f32 0.5, %v1207_v19  ;;  %v1202_v25 = vmul.f32 %v1200_v21, %v2064_v11 }
 0x697   : > { %v1209_v27 = vsub.f32 1.5, %v1208_v22  ;;  %v1204_v28 = vadd.f32 1e-05, %v1202_v25 }
 0x699   : > { %v1210_v30 = vmul.f32 %v1722_v14, %v1209_v27  ;;  %1723 = vrsqrt.f32 %v1204_v28  ;;  %vm1221_vm10 = vweird.f32 %v1204_v28 }
 0x69b   : > { %v1214_v33 = vsel %vm1213_vm8, %v1722_v14, %v1210_v30 }
 0x69c   : > { %v1225_v35 = vmul.f32 %v1214_v33, %v1191_v18  ;;  %v1684_v18 = vld [vmem:[%s1909_s19 + $0x3] ss:$0 sm:$0xff]  ;;  %v1685_v33 = vld [vmem:[%s1909_s19 + $0x4] ss:$0 sm:$0xff] }
 0x69e   : > { %v1228_v38 = vmul.f32 %v1681_v32, %v1225_v35  ;;  %v1686_v35 = vld [vmem:[%s1909_s19 + $0x5] ss:$0 sm:$0xff] }
 0x69f   : > { %v1724_v39 = vpop.eup %1723 }
 0x6a0   : > { %v1216_v41 = vmul.f32 %v1724_v39, %v1204_v28  ;;  %v1231_v42 = vadd.f32 %v1682_v36, %v1228_v38  ;;  %vm1222_vm9 = vweird.f32 %v1724_v39 }
 0x6a1   : > { %vm1223_vm11 = vmor %vm1221_vm10, %vm1222_vm9 }
 0x6a2   : > { %v1217_v44 = vmul.f32 %v1724_v39, %v1216_v41  ;;  %1626 = vmatmul.msk.f32.vlgmr.msrb.gmra.mxu2 %vm502_vm1, %v1231_v42 }
 0x6a4   : > { %v1218_v46 = vmul.f32 0.5, %v1217_v44 }
 0x6a6   : > { %v1219_v48 = vsub.f32 1.5, %v1218_v46 }
 0x6a8   : > { %v1220_v50 = vmul.f32 %v1724_v39, %v1219_v48 }
 0x6aa   : > { %v1224_v51 = vsel %vm1223_vm11, %v1724_v39, %v1220_v50 }
 0x6ab   : > { %v1226_v52 = vmul.f32 %v1224_v51, %v2069_v3 }
 0x6ad   : > { %v1229_v53 = vmul.f32 %v1681_v32, %v1226_v52 }
 0x6af   : > { %v1232_v54 = vadd.f32 %v1682_v36, %v1229_v53 }
 0x6b1   : > { %1627 = vmatmul.msk.f32.gmra.mxu2 %vm502_vm1, %v1232_v54 }
 0x725   : > { %v1264_v57 = vpop.f32.mrf.mxu2 }
 0x726   : > { %v1265_v58 = vadd.f32 %v1683_v56, %v1264_v57 }
 0x728   : > { %v1270_v59 = vmax.f32 %v1265_v58, 0.0 }
 0x72a   : > { %1306 = vmatmul.f32.vlgmr.msra.gmra.mxu3 %v1270_v59 }
 0x734   : > { %v1267_v60 = vpop.f32.mrf.mxu2 }
 0x735   : > { %v1268_v61 = vadd.f32 %v1683_v56, %v1267_v60 }
 0x737   : > { %v1271_v24 = vmax.f32 %v1268_v61, 0.0 }
 0x739   : > { %1309 = vmatmul.f32.gmra.mxu3 %v1271_v24 }
 0x7ad   : > { %v1307_v62 = vpop.f32.mrf.mxu3 }
 0x7ae   : > { %v1308_v0 = vadd.f32 %v1684_v18, %v1307_v62 }
 0x7b0   : > { %v1315_v1 = vadd.f32 %v1308_v0, %v1231_v42 }
 0x7b2   : > { %v1317_v2 = vsel %vm502_vm1, %v1315_v1, 0.0 }
 0x7b3   : > { %1318 = vadd.xlane.f32.xlu1 %v1317_v2 }
 0x7bc   : > { %v1310_v3 = vpop.f32.mrf.mxu3 }
 0x7bd   : > { %v1311_v4 = vadd.f32 %v1684_v18, %v1310_v3 }
 0x7bf   : > { %v1316_v5 = vadd.f32 %v1311_v4, %v1232_v54 }
 0x7c1   : > { %v1320_v6 = vsel %vm502_vm1, %v1316_v5, 0.0 }
 0x7c2   : > { %1321 = vadd.xlane.f32.xlu1 %v1320_v6 }
 0x826   : > { %v1319_v7 = vpop.xlane.xlu1 %1318 }
 0x827   : > { %v1323_v8 = vmul.f32 %v1319_v7, %v2064_v11 }
 0x829   : > { %v1325_v9 = vsub.f32 %v1315_v1, %v1323_v8 }
 0x82b   : > { %v1327_v10 = vmul.f32 %v1325_v9, %v1325_v9 }
 0x82d   : > { %v1329_v12 = vsel %vm502_vm1, %v1327_v10, 0.0 }
 0x82e   : > { %1330 = vadd.xlane.f32.xlu1 %v1329_v12 }
 0x835   : > { %v1322_v13 = vpop.xlane.xlu1 %1321 }
 0x836   : > { %v1324_v14 = vmul.f32 %v1322_v13, %v2064_v11 }
 0x838   : > { %v1326_v15 = vsub.f32 %v1316_v5, %v1324_v14 }
 0x83a   : > { %v1328_v16 = vmul.f32 %v1326_v15, %v1326_v15 }
 0x83c   : > { %v1332_v17 = vsel %vm502_vm1, %v1328_v16, 0.0 }
 0x83d   : > { %1333 = vadd.xlane.f32.xlu1 %v1332_v17 }
 0x8a1   : > { %v1331_v19 = vpop.xlane.xlu1 %1330 }
 0x8a2   : > { %v1335_v20 = vmul.f32 %v1331_v19, %v2064_v11 }
 0x8a4   : > { %v1337_v21 = vadd.f32 1e-05, %v1335_v20 }
 0x8a6   : > { %1725 = vrsqrt.f32 %v1337_v21  ;;  %vm1345_vm13 = vweird.f32 %v1337_v21 }
 0x8ac   : > { %v1726_v22 = vpop.eup %1725 }
 0x8ad   : > { %v1340_v25 = vmul.f32 %v1726_v22, %v1337_v21  ;;  %vm1346_vm12 = vweird.f32 %v1726_v22 }
 0x8ae   : > { %vm1347_vm14 = vmor %vm1345_vm13, %vm1346_vm12 }
 0x8af   : > { %v1341_v26 = vmul.f32 %v1726_v22, %v1340_v25 }
 0x8b0   : > { %v1334_v27 = vpop.xlane.xlu1 %1333 }
 0x8b1   : > { %v1342_v28 = vmul.f32 0.5, %v1341_v26  ;;  %v1336_v29 = vmul.f32 %v1334_v27, %v2064_v11 }
 0x8b3   : > { %v1343_v30 = vsub.f32 1.5, %v1342_v28  ;;  %v1338_v31 = vadd.f32 1e-05, %v1336_v29 }
 0x8b5   : > { %v1344_v32 = vmul.f32 %v1726_v22, %v1343_v30  ;;  %1727 = vrsqrt.f32 %v1338_v31  ;;  %vm1355_vm0 = vweird.f32 %v1338_v31 }
 0x8b7   : > { %v1348_v34 = vsel %vm1347_vm14, %v1726_v22, %v1344_v32 }
 0x8b8   : > { %v1359_v36 = vmul.f32 %v1348_v34, %v1325_v9 }
 0x8ba   : > { %v1362_v37 = vmul.f32 %v1685_v33, %v1359_v36 }
 0x8bb   : > { %v1728_v38 = vpop.eup %1727 }
 0x8bc   : > { %v1365_v39 = vadd.f32 %v1686_v35, %v1362_v37  ;;  %v1350_v40 = vmul.f32 %v1728_v38, %v1338_v31  ;;  %vm1356_vm15 = vweird.f32 %v1728_v38 }
 0x8bd   : > { %vm1357_vm2 = vmor %vm1355_vm0, %vm1356_vm15 }
 0x8be   : > { %v1351_v41 = vmul.f32 %v1728_v38, %v1350_v40 }
 0x8c0   : > { %v1352_v42 = vmul.f32 0.5, %v1351_v41 }
 0x8c2   : > { %v1353_v43 = vsub.f32 1.5, %v1352_v42 }
 0x8c4   : > { %v1354_v11 = vmul.f32 %v1728_v38, %v1353_v43 }
 0x8c6   : > { %v1358_v44 = vsel %vm1357_vm2, %v1728_v38, %v1354_v11 }
 0x8c7   : > { %v1360_v45 = vmul.f32 %v1358_v44, %v1326_v15  ;;  %1370 = sbr.rel (%p1628_p6) target bundleno = 2254 (0x8ce), region = 68 }
 0x8c9   : > { %v1363_v46 = vmul.f32 %v1685_v33, %v1360_v45 }
 0x8cb   : > { %v1366_v47 = vadd.f32 %v1686_v35, %v1363_v46 }
 0x8cc   : > { %1371 = vst.msk [vmem:[#allocation2] sm:$0xff] %vm502_vm1, %v1365_v39 }
 0x8cd   : > { %1372 = vst.msk [vmem:[#allocation2 + $0x8] sm:$0xff] %vm502_vm1, %v1366_v47 }
 0x8ce PF: > { %p1629_p7 = scmp.ne.s32.totalorder %s1782_s13, 1 }
 0x8d0   : > { %1376 = sbr.rel (%p1629_p7) target bundleno = 2668 (0xa6c), region = 72 }
 0x8d5   : > { %v1403_v48 = vld [vmem:[%s2161_s8 + $0x18] sm:$0xff]  ;;  %v1402_v49 = vld [vmem:[%s2161_s8 + $0x10] sm:$0xff]  ;;  %v1377_v50 = vsel %vm502_vm1, %v1365_v39, 0.0  ;;  %v1384_v51 = vsel %vm502_vm1, %v1366_v47, 0.0  ;;  %v1796_v54 = vmov 8.0   ;;  %v1401_v23 = vld [vmem:[%s2161_s8 + $0x8] sm:$0xff] }
 0x8d6   : > { %1426 = vmatpush.msra.mxu0 %v1403_v48  ;;  %v1378_v52 = vrot.slane %v1377_v50, 4  ;;  %v1385_v53 = vrot.slane %v1384_v51, 4  ;;  %1730 = vrcp.f32 %v1796_v54  ;;  %v1400_v56 = vld [vmem:[%s2161_s8] sm:$0xff]  ;;  %vm1410_vm4 = vcmask 1041409  }
 0x8d7   : > { %v1729_v9 = vld [vmem:[%s2162_s9] ss:$0 sm:$0xff]  ;;  %vm1434_vm5 = vcmask 1041408  }
 0x8d8   : > { %1427 = vmatpush.msra.mxu0 %v1402_v49  ;;  %v1379_v55 = vadd.f32 %v1378_v52, %v1377_v50  ;;  %v1386_v63 = vadd.f32 %v1385_v53, %v1384_v51 }
 0x8da   : > { %1428 = vmatpush.msra.mxu0 %v1401_v23  ;;  %v1380_v57 = vrot.slane %v1379_v55, 2  ;;  %v1387_v58 = vrot.slane %v1386_v63, 2 }
 0x8dc   : > { %v1731_v59 = vpop.eup %1730  ;;  %1429 = vmatpush.msra.mxu0 %v1400_v56  ;;  %v1381_v60 = vadd.f32 %v1380_v57, %v1379_v55  ;;  %v1388_v61 = vadd.f32 %v1387_v58, %v1386_v63 }
 0x8dd   : > { %v1392_v24 = vmul.f32 8.0, %v1731_v59  ;;  %vm1396_vm3 = vweird.f32 %v1731_v59 }
 0x8de   : > { %v1382_v18 = vrot.slane %v1381_v60, 1  ;;  %v1389_v62 = vrot.slane %v1388_v61, 1 }
 0x8df   : > { %v1393_v0 = vsub.f32 1.0, %v1392_v24 }
 0x8e0   : > { %v1383_v2 = vadd.f32 %v1382_v18, %v1381_v60  ;;  %v1390_v3 = vadd.f32 %v1389_v62, %v1388_v61 }
 0x8e1   : > { %v1394_v1 = vmul.f32 %v1731_v59, %v1393_v0 }
 0x8e3   : > { %v1395_v4 = vadd.f32 %v1731_v59, %v1394_v1 }
 0x8e5   : > { %v1397_v5 = vsel %vm1396_vm3, %v1731_v59, %v1395_v4 }
 0x8e6   : > { %v1398_v6 = vmul.f32 %v1397_v5, %v1383_v2  ;;  %v1399_v7 = vmul.f32 %v1397_v5, %v1390_v3 }
 0x8e8   : > { %v1411_v8 = vsel %vm1410_vm4, %v1399_v7, %v1398_v6 }
 0x8e9   : > { %1630 = vmatmul.msk.f32.vlgmr.msra.gmra.mxu0 %vm502_vm1, %v1411_v8 }
 0x966   : > { %v1431_v10 = vpop.f32.mrf.mxu0 }
 0x967   : > { %v1432_v12 = vadd.f32 %v1729_v9, %v1431_v10 }
 0x969   : > { %v1435_v13 = vsel %vm1434_vm5, %v1432_v12, -inf }
 0x96a   : > { %1436 = vmax.xlane.f32.xlu0 %v1435_v13 }
 0x9dd   : > { %v1437_v14 = vpop.xlane.xlu0 %1436 }
 0x9de   : > { %v1438_v15 = vsub.f32 %v1432_v12, %v1437_v14 }
 0x9e0   : > { %v1439_v16 = vmul.f32 1.442695, %v1438_v15 }
 0x9e2   : > { %1732 = vpow2.f32 %v1439_v16 }
 0x9e8   : > { %v1733_v17 = vpop.eup %1732 }
 0x9e9   : > { %v1441_v19 = vsel %vm1434_vm5, %v1733_v17, 0.0 }
 0x9ea   : > { %1442 = vadd.xlane.f32.xlu0 %v1441_v19 }
 0xa5d   : > { %v1443_v20 = vpop.xlane.xlu0 %1442 }
 0xa5e   : > { %1734 = vlog2.f32 %v1443_v20 }
 0xa64   : > { %v1735_v21 = vpop.eup %1734 }
 0xa65   : > { %v1445_v22 = vmul.f32 0.6931472, %v1735_v21 }
 0xa67   : > { %v1446_v25 = vadd.f32 %v1445_v22, %v1437_v14 }
 0xa69   : > { %v1447_v26 = vsub.f32 %v1432_v12, %v1446_v25 }
 0xa6b   : > { %1448 = vst [vmem:[#allocation3] sm:$0x3] %v1447_v26 }
 0xa6c PF: > { %s2170_s24 = sadd.s32 4294967295, %s1790_s15   ;;  %s2171_s28 = sld [smem:[#allocation9_spill]] }
 0xa6d   : > { %p1643_p8 = scmp.eq.s32.totalorder %s2170_s24, 1  ;;  %s1797_s17 = smov [#allocation3]  }
 0xa6e   : > { %s1457_s3 = sshll.u32 %s1797_s17, 4  ;;  %s1458_s3 = int_to_ptr.vmem [resolvable:$true] %s1457_s3 }
 0xa72   : > { %s1459_s14 = sshll.u32 %s2171_s28, 4  ;;  %s1460_s14 = int_to_ptr.hbm [resolvable:$true] %s1459_s14 }
 0xa73   : > { %1640 = dma.vmem_to_hbm [thread:$0]  (%p1643_p8), %s1458_s3, 32, %s1460_s14, [#allocation4]  }
 0xa74   : > { %1777 = dma.done.wait (%p1643_p8), [#allocation4], 32  }
 0xa75   : > { %1779 = vsyncadd (%p1643_p8), [#allocation4], 4294967264 }
 0xa76 PF: > { %s21_s15 = sadd.s32 1, %s1790_s15   ;;  %s2172_s13 = sld [smem:[#allocation6_spill]] }
 0xa77   : > { %p18_p9 = scmp.ge.s32.totalorder %s21_s15, 4   ;;  %s2173_s14 = sld [smem:[#allocation7_spill]] }
 0xa79   :  { %20 = sbr.rel (!%p18_p9) target bundleno = 5 (0x5), region = 118 }
 0xa7e   :  { %1473 = vsyncpa [#allocation4], 1 }
 0xa7f   :  { %1475 = vsyncpa [#allocation4 + $0x1], 1 }

</bundles_post_ra>
